<compile_context>
chip_gen: v7x
topology: tpu7x:2x2x1
jax: 0.10.0
libtpu: 0.0.40
codegen_flags: <defaults>
</compile_context>

<pallas_src>
import jax
import jax.numpy as jnp
from jax.experimental import pallas as pl
from jax.experimental.pallas import tpu as pltpu

ENCODING_DIM = 64
INPUT_DIM = 256     # synthetic stand-in for X.shape[1] (data file not read here)
HIDDEN_DIM = 128


def autoencoder_kernel(x_ref,
                       w1_ref, b1_ref,
                       w23_ref, b23_ref,
                       w4_ref, b4_ref,
                       o_ref):
    """Fused encoder+decoder for one (tb, INPUT_DIM) batch tile.

    Weights arrive in bf16; activations are cast to bf16 before each MXU push;
    accumulation and bias add stay f32.  The encoder's second Linear and the
    decoder's first Linear (no nonlinearity between them) are pre-folded into
    w23/b23 by the wrapper.
    """
    x = x_ref[...].astype(jnp.bfloat16)                               # (tb, INPUT_DIM)

    # encoder Linear(INPUT_DIM, 128) + ReLU
    h1 = jnp.dot(x, w1_ref[...], preferred_element_type=jnp.float32) + b1_ref[...]
    h1 = jnp.maximum(h1, 0.0).astype(jnp.bfloat16)

    # folded (encoder Linear(128,64) ∘ decoder Linear(64,128)) + ReLU
    h2 = jnp.dot(h1, w23_ref[...], preferred_element_type=jnp.float32) + b23_ref[...]
    h2 = jnp.maximum(h2, 0.0).astype(jnp.bfloat16)

    # decoder Linear(128, INPUT_DIM)
    y = jnp.dot(h2, w4_ref[...], preferred_element_type=jnp.float32) + b4_ref[...]

    o_ref[...] = y.astype(o_ref.dtype)


def fold_params(params, matmul_dtype=jnp.bfloat16):
    """Fold the two affine layers around the 64-wide bottleneck (exact in f32),
    then cast weight matrices once to the MXU dtype. Biases stay f32."""
    w1, b1, w2, b2, w3, b3, w4, b4 = params
    w23 = w2 @ w3                      # (128, 64) @ (64, 128) -> (128, 128)
    b23 = b2 @ w3 + b3                 # (1, 128)
    return (w1.astype(matmul_dtype), b1,
            w23.astype(matmul_dtype), b23,
            w4.astype(matmul_dtype), b4)


def _default_tb(B, tb_max=512):
    """Pick a batch tile: multiple of 8 (ideally 256), <= B, and giving a grid
    of >= 2 steps whenever B allows it (keeps both v7x TensorCores fed)."""
    if B < 8:
        return B                              # block == full array dim is legal
    if B < 256:
        return (B // 8) * 8                   # sublane-aligned, partial last block
    tb = min(tb_max, (B // 256) * 256)        # MXU-height multiples, capped
    if B >= 512 and pl.cdiv(B, tb) < 2:
        tb = max(256, ((B // 2) // 256) * 256)  # split so grid has >= 2 steps
    return tb


def autoencoder_forward(x, folded_params, *, tb=None):
    """x: (B, INPUT_DIM) float32. Returns the (B, INPUT_DIM) float32
    reconstruction. Any B is accepted; no padding pass — the last grid block
    may be partial (Pallas masks out-of-bounds stores)."""
    B, D = x.shape
    assert D == INPUT_DIM

    w1, b1, w23, b23, w4, b4 = folded_params

    if tb is None:
        tb = _default_tb(B)
    grid = (pl.cdiv(B, tb),)

    def full_spec(shape):
        # Weights/biases: single full-extent block, constant block index across
        # the batch grid -> stay resident in VMEM, no per-step re-DMA.
        return pl.BlockSpec(shape, lambda i, _s=shape: tuple(0 for _ in _s))

    grid_spec = pltpu.PrefetchScalarGridSpec(
        num_scalar_prefetch=0,
        grid=grid,
        in_specs=[
            pl.BlockSpec((tb, INPUT_DIM), lambda i: (i, 0)),   # x tile
            full_spec(w1.shape), full_spec(b1.shape),
            full_spec(w23.shape), full_spec(b23.shape),
            full_spec(w4.shape), full_spec(b4.shape),
        ],
        out_specs=pl.BlockSpec((tb, INPUT_DIM), lambda i: (i, 0)),
    )

    return pl.pallas_call(
        autoencoder_kernel,
        out_shape=jax.ShapeDtypeStruct((B, INPUT_DIM), jnp.float32),
        grid_spec=grid_spec,
        compiler_params=pltpu.CompilerParams(
            dimension_semantics=("parallel",)),
    )(x, w1, b1, w23, b23, w4, b4)


def init_params(key):
    """Deterministic PyTorch-style init: U(-1/sqrt(fan_in), 1/sqrt(fan_in)).
    Weights stored as (in_features, out_features) so y = x @ W + b."""
    dims = [(INPUT_DIM, HIDDEN_DIM),       # encoder.0
            (HIDDEN_DIM, ENCODING_DIM),    # encoder.2
            (ENCODING_DIM, HIDDEN_DIM),    # decoder.0
            (HIDDEN_DIM, INPUT_DIM)]       # decoder.2
    params = []
    keys = jax.random.split(key, 2 * len(dims))
    for idx, (fan_in, fan_out) in enumerate(dims):
        bound = 1.0 / (fan_in ** 0.5)
        w = jax.random.uniform(keys[2 * idx], (fan_in, fan_out),
                               minval=-bound, maxval=bound, dtype=jnp.float32)
        b = jax.random.uniform(keys[2 * idx + 1], (1, fan_out),
                               minval=-bound, maxval=bound, dtype=jnp.float32)
        params += [w, b]
    return tuple(params)


def autoencoder_ref_f32(x, params):
    """Pure-JAX f32 reference (unfolded; matches the PyTorch forward)."""
    w1, b1, w2, b2, w3, b3, w4, b4 = params
    h1 = jnp.maximum(x @ w1 + b1, 0.0)
    z = h1 @ w2 + b2
    h2 = jnp.maximum(z @ w3 + b3, 0.0)
    return h2 @ w4 + b4


def autoencoder_ref_bf16(x, folded_params):
    """Pure-JAX reference using the same folded bf16-weight / f32-accumulate
    recipe as the kernel (tight check of the Pallas lowering itself)."""
    w1, b1, w23, b23, w4, b4 = folded_params
    h1 = jnp.maximum(
        jnp.dot(x.astype(jnp.bfloat16), w1, preferred_element_type=jnp.float32) + b1, 0.0)
    h2 = jnp.maximum(
        jnp.dot(h1.astype(jnp.bfloat16), w23, preferred_element_type=jnp.float32) + b23, 0.0)
    return jnp.dot(h2.astype(jnp.bfloat16), w4, preferred_element_type=jnp.float32) + b4


if __name__ == "__main__":
    key = jax.random.PRNGKey(0)
    pkey, xkey = jax.random.split(key)

    params = init_params(pkey)
    folded = fold_params(params)

    # Ragged batch, multi-step even grid (B=384 -> tb=256 -> 2 steps, last partial).
    B = 384
    x = jax.random.normal(xkey, (B, INPUT_DIM), dtype=jnp.float32)

    out = jax.block_until_ready(autoencoder_forward(x, folded))
    assert out.shape == (B, INPUT_DIM)

    ref32 = autoencoder_ref_f32(x, params)
    ref16 = autoencoder_ref_bf16(x, folded)
    # Tight vs. an identically-quantized reference; loose vs. the f32 reference
    # (difference is bf16 matmul rounding, expected).
    assert jnp.allclose(out, ref16, atol=2e-3, rtol=2e-3)
    assert jnp.allclose(out, ref32, atol=3e-2, rtol=3e-2)

    # Small ragged batch (B=100 -> tb=96 -> 2 steps, 4 valid rows in last block).
    out_small = jax.block_until_ready(autoencoder_forward(x[:100], folded))
    assert out_small.shape == (100, INPUT_DIM)
    assert jnp.allclose(out_small, ref16[:100], atol=2e-3, rtol=2e-3)
    assert jnp.allclose(out_small, ref32[:100], atol=3e-2, rtol=3e-2)

    print("KERNEL_OK")
</pallas_src>

<mosaic_0001>
module attributes {stable_mosaic.version = 11 : i64} {
  func.func @autoencoder_kernel(%arg0: i32, %arg1: memref<256x256xf32, #tpu.memory_space<vmem>>, %arg2: memref<256x128xbf16, #tpu.memory_space<vmem>>, %arg3: memref<1x128xf32, #tpu.memory_space<vmem>>, %arg4: memref<128x128xbf16, #tpu.memory_space<vmem>>, %arg5: memref<1x128xf32, #tpu.memory_space<vmem>>, %arg6: memref<128x256xbf16, #tpu.memory_space<vmem>>, %arg7: memref<1x256xf32, #tpu.memory_space<vmem>>, %arg8: memref<256x256xf32, #tpu.memory_space<vmem>>) attributes {dimension_semantics = [#tpu.dimension_semantics<parallel>], iteration_bounds = array<i64: 2>, scalar_prefetch = 0 : i64, scratch_operands = 0 : i64, tpu.core_type = #tpu.core_type<tc>, window_params = [{transform_indices = @transform_0, window_bounds = array<i64: 256, 256>}, {pipeline_mode = #tpu.pipeline_mode<synchronous>, transform_indices = @transform_1, window_bounds = array<i64: 256, 128>}, {pipeline_mode = #tpu.pipeline_mode<synchronous>, transform_indices = @transform_2, window_bounds = array<i64: 1, 128>}, {pipeline_mode = #tpu.pipeline_mode<synchronous>, transform_indices = @transform_3, window_bounds = array<i64: 128, 128>}, {pipeline_mode = #tpu.pipeline_mode<synchronous>, transform_indices = @transform_4, window_bounds = array<i64: 1, 128>}, {pipeline_mode = #tpu.pipeline_mode<synchronous>, transform_indices = @transform_5, window_bounds = array<i64: 128, 256>}, {pipeline_mode = #tpu.pipeline_mode<synchronous>, transform_indices = @transform_6, window_bounds = array<i64: 1, 256>}, {transform_indices = @transform_7, window_bounds = array<i64: 256, 256>}]} {
    %c0 = arith.constant 0 : index
    %c0_0 = arith.constant 0 : index
    %0 = vector.load %arg1[%c0, %c0_0] : memref<256x256xf32, #tpu.memory_space<vmem>>, vector<256x256xf32>
    %1 = arith.truncf %0 : vector<256x256xf32> to vector<256x256xbf16>
    %c0_1 = arith.constant 0 : index
    %c0_2 = arith.constant 0 : index
    %2 = vector.load %arg2[%c0_1, %c0_2] : memref<256x128xbf16, #tpu.memory_space<vmem>>, vector<256x128xbf16>
    %cst = arith.constant dense<0.000000e+00> : vector<256x128xf32>
    %3 = tpu.matmul %1, %2, %cst {dimension_numbers = #tpu.dot_dimension_numbers<[1], [0], [0], [1], [0, 0, 1, 1], [], []>} : vector<256x256xbf16>, vector<256x128xbf16>, vector<256x128xf32> -> vector<256x128xf32>
    %c0_3 = arith.constant 0 : index
    %c0_4 = arith.constant 0 : index
    %4 = vector.load %arg3[%c0_3, %c0_4] : memref<1x128xf32, #tpu.memory_space<vmem>>, vector<1x128xf32>
    %5 = vector.broadcast %4 : vector<1x128xf32> to vector<256x128xf32>
    %6 = arith.addf %3, %5 : vector<256x128xf32>
    %cst_5 = arith.constant 0.000000e+00 : f32
    %7 = vector.broadcast %cst_5 : f32 to vector<256x128xf32>
    %8 = arith.maximumf %6, %7 : vector<256x128xf32>
    %9 = arith.truncf %8 : vector<256x128xf32> to vector<256x128xbf16>
    %c0_6 = arith.constant 0 : index
    %c0_7 = arith.constant 0 : index
    %10 = vector.load %arg4[%c0_6, %c0_7] : memref<128x128xbf16, #tpu.memory_space<vmem>>, vector<128x128xbf16>
    %cst_8 = arith.constant dense<0.000000e+00> : vector<256x128xf32>
    %11 = tpu.matmul %9, %10, %cst_8 {dimension_numbers = #tpu.dot_dimension_numbers<[1], [0], [0], [1], [0, 0, 1, 1], [], []>} : vector<256x128xbf16>, vector<128x128xbf16>, vector<256x128xf32> -> vector<256x128xf32>
    %c0_9 = arith.constant 0 : index
    %c0_10 = arith.constant 0 : index
    %12 = vector.load %arg5[%c0_9, %c0_10] : memref<1x128xf32, #tpu.memory_space<vmem>>, vector<1x128xf32>
    %13 = vector.broadcast %12 : vector<1x128xf32> to vector<256x128xf32>
    %14 = arith.addf %11, %13 : vector<256x128xf32>
    %cst_11 = arith.constant 0.000000e+00 : f32
    %15 = vector.broadcast %cst_11 : f32 to vector<256x128xf32>
    %16 = arith.maximumf %14, %15 : vector<256x128xf32>
    %17 = arith.truncf %16 : vector<256x128xf32> to vector<256x128xbf16>
    %c0_12 = arith.constant 0 : index
    %c0_13 = arith.constant 0 : index
    %18 = vector.load %arg6[%c0_12, %c0_13] : memref<128x256xbf16, #tpu.memory_space<vmem>>, vector<128x256xbf16>
    %cst_14 = arith.constant dense<0.000000e+00> : vector<256x256xf32>
    %19 = tpu.matmul %17, %18, %cst_14 {dimension_numbers = #tpu.dot_dimension_numbers<[1], [0], [0], [1], [0, 0, 1, 1], [], []>} : vector<256x128xbf16>, vector<128x256xbf16>, vector<256x256xf32> -> vector<256x256xf32>
    %c0_15 = arith.constant 0 : index
    %c0_16 = arith.constant 0 : index
    %20 = vector.load %arg7[%c0_15, %c0_16] : memref<1x256xf32, #tpu.memory_space<vmem>>, vector<1x256xf32>
    %21 = vector.broadcast %20 : vector<1x256xf32> to vector<256x256xf32>
    %22 = arith.addf %19, %21 : vector<256x256xf32>
    %c0_17 = arith.constant 0 : index
    %c0_18 = arith.constant 0 : index
    %23 = vector.load %arg8[%c0_17, %c0_18] : memref<256x256xf32, #tpu.memory_space<vmem>>, vector<256x256xf32>
    tpu.vector_store %arg8[%c0_17, %c0_18], %22 {strides = array<i32>} : memref<256x256xf32, #tpu.memory_space<vmem>>, vector<256x256xf32>,
    return
  }
  func.func @transform_0(%arg0: i32) -> (i32, i32) {
    %c0_i32 = arith.constant 0 : i32
    %c0_i32_0 = arith.constant 0 : i32
    return %arg0, %c0_i32 : i32, i32
  }
  func.func @transform_1(%arg0: i32) -> (i32, i32) {
    %c0_i32 = arith.constant 0 : i32
    %c0_i32_0 = arith.constant 0 : i32
    %c0_i32_1 = arith.constant 0 : i32
    return %c0_i32, %c0_i32_0 : i32, i32
  }
  func.func @transform_2(%arg0: i32) -> (i32, i32) {
    %c0_i32 = arith.constant 0 : i32
    %c0_i32_0 = arith.constant 0 : i32
    %c0_i32_1 = arith.constant 0 : i32
    return %c0_i32, %c0_i32_0 : i32, i32
  }
  func.func @transform_3(%arg0: i32) -> (i32, i32) {
    %c0_i32 = arith.constant 0 : i32
    %c0_i32_0 = arith.constant 0 : i32
    %c0_i32_1 = arith.constant 0 : i32
    return %c0_i32, %c0_i32_0 : i32, i32
  }
  func.func @transform_4(%arg0: i32) -> (i32, i32) {
    %c0_i32 = arith.constant 0 : i32
    %c0_i32_0 = arith.constant 0 : i32
    %c0_i32_1 = arith.constant 0 : i32
    return %c0_i32, %c0_i32_0 : i32, i32
  }
  func.func @transform_5(%arg0: i32) -> (i32, i32) {
    %c0_i32 = arith.constant 0 : i32
    %c0_i32_0 = arith.constant 0 : i32
    %c0_i32_1 = arith.constant 0 : i32
    return %c0_i32, %c0_i32_0 : i32, i32
  }
  func.func @transform_6(%arg0: i32) -> (i32, i32) {
    %c0_i32 = arith.constant 0 : i32
    %c0_i32_0 = arith.constant 0 : i32
    %c0_i32_1 = arith.constant 0 : i32
    return %c0_i32, %c0_i32_0 : i32, i32
  }
  func.func @transform_7(%arg0: i32) -> (i32, i32) {
    %c0_i32 = arith.constant 0 : i32
    %c0_i32_0 = arith.constant 0 : i32
    return %arg0, %c0_i32 : i32, i32
  }
}

</mosaic_0001>

<bundles_post_ra>
// kernel: tpu_custom_call.1
= control target key start
LH: loop header
LB: loop body
LE: loop exit
PB: predicated region body
PF: predicated region fallthrough
CT: control target
= control target key end

     0   :  { %s2785_s0 = inlined_call_operand.hbm [shape: f32[384,256], index: 0, kind: input, shape index: {}]   ;;  %s2786_s1 = inlined_call_operand.hbm [shape: bf16[256,128], index: 1, kind: input, shape index: {}]   ;;  %s2787_s2 = inlined_call_operand.vmem [shape: f32[1,128], index: 2, kind: input, shape index: {}]   ;;  %s2788_s3 = inlined_call_operand.hbm [shape: bf16[128,128], index: 3, kind: input, shape index: {}]   ;;  %s2789_s4 = inlined_call_operand.vmem [shape: f32[1,128], index: 4, kind: input, shape index: {}]   ;;  %s2790_s5 = inlined_call_operand.hbm [shape: bf16[128,256], index: 5, kind: input, shape index: {}]   ;;  %s2791_s6 = inlined_call_operand.vmem [shape: f32[1,256], index: 6, kind: input, shape index: {}]   ;;  %s2792_s7 = inlined_call_operand.hbm [shape: f32[384,256], index: 7, kind: output, shape index: {}]  }
   0x1   :  { %2800 = sst [smem:[#allocation19_spill]] %s2786_s1 }
   0x2   :  { %12 = vsyncpa [#allocation3], 0 }
   0x3   :  { %14 = vsyncpa [#allocation3 + $0x1], 0 }
   0x4   :  { %15 = vsyncpa [#allocation6], 0 }
   0x5   :  { %16 = vsyncpa [#allocation9], 0 }
   0x6   :  { %17 = vsyncpa [#allocation4], 0 }
   0x7   :  { %19 = vsyncpa [#allocation4 + $0x1], 0  ;;  %s2220_s24 = smov 0   ;;  %s2222_s25 = smov 0  }
   0x8   :  { %s2224_s26 = smov 0   ;;  %s2226_s27 = smov 0  }
   0x9 LB: > { %2801 = sst [smem:[#allocation15_spill]] %s2152_s24  ;;  %s2241_s28 = sadd.s32 4294967295, %s2164_s27   ;;  %s2164_s27 = sphi %s2226_s27, %s2824_s27   ;;  %s2160_s26 = sphi %s2224_s26, %s2828_s26   ;;  %s2156_s25 = sphi %s2222_s25, %s2827_s25   ;;  %s2152_s24 = sphi %s2220_s24, %s2826_s24  }
   0xa   : > { %s1571_s29 = sadd.s32 4294967294, %s2164_s27   ;;  %s2245_s30 = sadd.s32 1, %s2164_s27  }
   0xb   : > { %2802 = sst [smem:[#allocation16_spill]] %s2245_s30  ;;  %s32_s8 = sadd.s32 1, %s2160_s26 }
   0xc   : > { %s29_s9 = ssub.s32 %s2164_s27, %s2245_s30  ;;  %p39_p0 = scmp.ne.s32.totalorder %s2160_s26, %s2156_s25 }
   0xd   : > { %p30_p1 = scmp.eq.s32.totalorder %s29_s9, 0  ;;  %p40_p2 = scmp.eq.s32.totalorder %s2164_s27, 0 }
   0xe   : > { %p45_p3 = scmp.ne.s32.totalorder %s2156_s25, %s2152_s24  ;;  %p2793_p4 = scmp.eq.s32.totalorder %s2241_s28, 0 }
   0xf   : > { %s2257_s10 = scalar_select %p30_p1, %s2160_s26, %s32_s8  }
  0x10   : > { %p2259_p5 = por %p40_p2, %p39_p0  ;;  %p2265_p6 = por %p2793_p4, %p45_p3 }
  0x11   : > { %2803 = sst [smem:[#allocation17_spill]] %s2257_s10  ;;  %p195_p7 = scmp.eq.s32.totalorder %s2241_s28, 1 }
  0x12   : > { %s2804_s11 = scalar_select %p2259_p5, 1, 0 }
  0x13   : > { %s2805_s12 = scalar_select %p2265_p6, 1, 0 }
  0x14   : > { %p201_p8 = scmp.eq.s32.totalorder %s1571_s29, 1  ;;  %p1572_p9 = scmp.ge.s32.totalorder %s2164_s27, 1 }
  0x15   : > { %p208_p10 = scmp.lt.s32.totalorder %s2164_s27, 3  ;;  %p2272_p11 = por %p195_p7, %p39_p0 }
  0x16   : > { %p2276_p12 = por %p201_p8, %p45_p3  ;;  %s2166_s16 = smov [#allocation5]  }
  0x17   : > { %s2806_s13 = scalar_select %p2272_p11, 1, 0 }
  0x18   : > { %s2807_s14 = scalar_select %p2276_p12, 1, 0 }
  0x19   : > { %p2280_p13 = pnand %p1572_p9, %p208_p10  ;;  %s220_s17 = sshll.u32 %s2166_s16, 4  ;;  %s221_s17 = int_to_ptr.vmem [resolvable:$true] %s220_s17 }
  0x1a   : > { %2808 = sst [smem:[#allocation18_spill]] %s2807_s14  ;;  %s2167_s19 = smov [#allocation7]  }
  0x1b   : > { %s2809_s15 = scalar_select %p2280_p13, 1, 0 }
  0x1c   : > { %p1865_p1 = pneg %p2280_p13  ;;  %s236_s20 = sshll.u32 %s2167_s19, 4  ;;  %s2292_s20 = int_to_ptr.vmem [resolvable:$true] %s236_s20 }
  0x1d   : > { %s2811_s1 = sld [smem:[#allocation19_spill]] }
  0x1e   : > { %p2288_p2 = pnand %p1865_p1, %p2793_p4 }
  0x20   : > { %p2302_p3 = pneg %p2288_p2 }
  0x23   : > { %s1978_s23 = scalar_lea.hbm %s2811_s1, 2048 }
  0x24   : > { %p1979_p0 = scmp.ne.s32.totalorder %s2811_s1, %s1978_s23  ;;  %p1985_p9 = scmp.lt.u32.totalorder %s1978_s23, %s2811_s1 }
  0x26   : > { %p1981_p7 = pnand %p2302_p3, %p1979_p0 }
  0x28   : > { %p1982_p8 = pneg %p1981_p7 }
  0x2a   : > { %p1987_p10 = pnand %p1985_p9, %p1982_p8 }
  0x2c   : > { %1990 = shalt.err (!%p1987_p10)
}
  0x2d   : > { %s1991_s21 = scalar_lea.vmem %s221_s17, 2048  ;;  %p1999_p11 = scmp.lt.s32.totalorder %s221_s17, %s221_s17 }
  0x2e   : > { %p1992_p1 = scmp.ne.s32.totalorder %s221_s17, %s1991_s21  ;;  %p2000_p6 = scmp.lt.s32.totalorder %s1991_s21, %s1991_s21 }
  0x30   : > { %p1994_p4 = pnand %p1992_p1, %p2302_p3  ;;  %p2001_p13 = por %p2000_p6, %p1999_p11 }
  0x32   : > { %p1995_p12 = pneg %p1994_p4 }
  0x34   : > { %p2002_p5 = pnand %p2001_p13, %p1995_p12 }
  0x36   : > { %2005 = shalt.err (!%p2002_p5)
}
  0x37   : > { %s2168_s22 = smov 64   ;;  %s2169_s29 = smov 4  }
  0x38   : > { %1868 = dma.hbm_to_vmem [thread:$0]  (!%p2288_p2), %s2811_s1, 2048, %s221_s17, [#allocation6], %s2168_s22, %s2168_s22, %s2169_s29  }
  0x39   : > { %s2006_s10 = scalar_lea.hbm %s2788_s3, 1024 }
  0x3a   : > { %p2007_p4 = scmp.ne.s32.totalorder %s2788_s3, %s2006_s10  ;;  %p2013_p11 = scmp.lt.u32.totalorder %s2006_s10, %s2788_s3 }
  0x3c   : > { %p2009_p6 = pnand %p2007_p4, %p2302_p3 }
  0x3e   : > { %p2010_p5 = pneg %p2009_p6 }
  0x40   : > { %p2015_p12 = pnand %p2013_p11, %p2010_p5 }
  0x42   : > { %2018 = shalt.err (!%p2015_p12)
}
  0x43   : > { %s2019_s17 = scalar_lea.vmem %s2292_s20, 1024  ;;  %p2027_p8 = scmp.lt.s32.totalorder %s2292_s20, %s2292_s20 }
  0x44   : > { %p2020_p13 = scmp.ne.s32.totalorder %s2292_s20, %s2019_s17  ;;  %p2028_p9 = scmp.lt.s32.totalorder %s2019_s17, %s2019_s17 }
  0x46   : > { %p2022_p0 = pnand %p2020_p13, %p2302_p3  ;;  %p2029_p10 = por %p2028_p9, %p2027_p8 }
  0x48   : > { %p2023_p7 = pneg %p2022_p0 }
  0x4a   : > { %p2030_p1 = pnand %p2029_p10, %p2023_p7 }
  0x4c   : > { %2033 = shalt.err (!%p2030_p1)
}
  0x4d   : > { %1871 = dma.hbm_to_vmem [thread:$0]  (!%p2288_p2), %s2788_s3, 1024, %s2292_s20, [#allocation6], %s2168_s22, %s2168_s22, %s2169_s29  }
  0x4e   : > { %s2170_s10 = smov [#allocation8]   ;;  %s2034_s16 = scalar_lea.hbm %s2790_s5, 2048 }
  0x4f   : > { %s252_s14 = sshll.u32 %s2170_s10, 4  ;;  %p2035_p4 = scmp.ne.s32.totalorder %s2790_s5, %s2034_s16  ;;  %s253_s14 = int_to_ptr.vmem [resolvable:$true] %s252_s14 }
  0x50   : > { %p2041_p11 = scmp.lt.u32.totalorder %s2034_s16, %s2790_s5 }
  0x51   : > { %p2037_p6 = pnand %p2035_p4, %p2302_p3 }
  0x53   : > { %p2038_p5 = pneg %p2037_p6 }
  0x55   : > { %p2043_p12 = pnand %p2041_p11, %p2038_p5 }
  0x57   : > { %2046 = shalt.err (!%p2043_p12)
}
  0x58   : > { %s2047_s20 = scalar_lea.vmem %s253_s14, 2048  ;;  %p2055_p8 = scmp.lt.s32.totalorder %s253_s14, %s253_s14 }
  0x59   : > { %p2048_p13 = scmp.ne.s32.totalorder %s253_s14, %s2047_s20  ;;  %p2056_p9 = scmp.lt.s32.totalorder %s2047_s20, %s2047_s20 }
  0x5b   : > { %p2050_p0 = pnand %p2048_p13, %p2302_p3  ;;  %p2057_p10 = por %p2056_p9, %p2055_p8 }
  0x5d   : > { %p2051_p7 = pneg %p2050_p0 }
  0x5f   : > { %p2058_p1 = pnand %p2057_p10, %p2051_p7 }
  0x61   : > { %2061 = shalt.err (!%p2058_p1)
}
  0x62   : > { %s2171_s22 = smov 128   ;;  %s2172_s29 = smov 8  }
  0x63   : > { %1874 = dma.hbm_to_vmem [thread:$0]  (!%p2288_p2), %s2790_s5, 2048, %s253_s14, [#allocation9], %s2171_s22, %s2171_s22, %s2172_s29  }
  0x64   : > { %p1576_p4 = scmp.ge.s32.totalorder %s2164_s27, 2 }
  0x65   : > { %p2813_p3 = scmp.ne.s32.totalorder (!%p1576_p4), %s2804_s11, 0 }
  0x66   : > { %265 = sbr.rel (%p1576_p4) target bundleno = 144 (0x90), region = 40 }
  0x6d   : > { %268 = sbr.rel (!%p2813_p3) target bundleno = 144 (0x90), region = 44  ;;  %s269_s9 = sand.u32 (%p2813_p3), 1, %s2160_s26  }
  0x6e   : > { %s1578_s30 = sshll.u32 (%p2813_p3), %s2164_s27, 5  ;;  %s1577_s10 = sshll.u32 (%p2813_p3), %s269_s9, 9 }
  0x6f   : > { %s275_s8 = ssub.s32 (%p2813_p3), 48, %s1578_s30  ;;  %s2369_s23 = scalar_lea.sflag (%p2813_p3), [#allocation3], %s269_s9 }
  0x70   : > { %p276_p6 = scmp.lt.s32.totalorder (%p2813_p3), %s275_s8, 32  ;;  %s273_s16 = scalar_lea.vmem (%p2813_p3), [#allocation2], %s1577_s10 }
  0x74   : > { %s2830_s8 = smov (!%p276_p6, %s275_s8), 32 }
  0x75   : > { %s2366_s18 = sshll.u32 %s2830_s8, 8 }
  0x76   : > { %s281_s14 = ssub.s32 8192, %s2366_s18 }
  0x77   : > { %282 = vsyncadd %s2369_s23, %s281_s14  ;;  %p1581_p2 = scmp.ne.s32.totalorder %s2366_s18, 0  ;;  %s1647_s11 = sshll.u32 %s2164_s27, 13 }
  0x78   : > { %s2377_s17 = scalar_lea.hbm %s2785_s0, %s1647_s11  ;;  %s288_s20 = sshll.u32 %s273_s16, 4  ;;  %s2379_s20 = int_to_ptr.vmem [resolvable:$true] %s288_s20 }
  0x79   : > { %s2062_s22 = scalar_lea.hbm %s2377_s17, %s2366_s18  ;;  %s2066_s1 = scalar_lea.hbm %s2785_s0, 12288 }
  0x7a   : > { %p2063_p5 = scmp.ne.s32.totalorder %s2377_s17, %s2062_s22  ;;  %p2067_p13 = scmp.lt.u32.totalorder %s2377_s17, %s2785_s0 }
  0x7b   : > { %p2068_p0 = scmp.lt.u32.totalorder %s2066_s1, %s2062_s22  ;;  %p2070_p8 = scmp.lt.u32.totalorder %s2062_s22, %s2377_s17 }
  0x7c   : > { %p2064_p11 = pnand %p2063_p5, %p1581_p2 }
  0x7d   : > { %p2069_p7 = por %p2068_p0, %p2067_p13 }
  0x7e   : > { %p2065_p12 = pneg %p2064_p11 }
  0x7f   : > { %p2071_p9 = por %p2070_p8, %p2069_p7 }
  0x81   : > { %p2072_p10 = pnand %p2071_p9, %p2065_p12 }
  0x83   : > { %2075 = shalt.err (!%p2072_p10)
}
  0x84   : > { %s2076_s10 = scalar_lea.vmem %s2379_s20, %s2366_s18  ;;  %s2173_s8 = smov [#allocation2]  }
  0x85   : > { %p2077_p1 = scmp.ne.s32.totalorder %s2379_s20, %s2076_s10  ;;  %s2080_s14 = sshll.u32 %s2173_s8, 4  ;;  %s2081_s14 = int_to_ptr.vmem [resolvable:$false] %s2080_s14 }
  0x86   : > { %s2082_s16 = scalar_lea.vmem %s2081_s14, 16384  ;;  %p2083_p5 = scmp.lt.s32.totalorder %s2379_s20, %s2081_s14 }
  0x87   : > { %p2078_p3 = pnand %p2077_p1, %p1581_p2  ;;  %p2084_p11 = scmp.lt.s32.totalorder %s2082_s16, %s2076_s10 }
  0x89   : > { %p2079_p6 = pneg %p2078_p3  ;;  %p2085_p13 = por %p2084_p11, %p2083_p5 }
  0x8b   : > { %p2086_p0 = pnand %p2085_p13, %p2079_p6 }
  0x8d   : > { %2089 = shalt.err (!%p2086_p0)
}
  0x8e   : > { %s2174_s11 = smov 256   ;;  %s2175_s19 = smov 16  }
  0x8f   : > { %294 = dma.hbm_to_vmem [thread:$0]  (%p1581_p2), %s2377_s17, %s2366_s18, %s2379_s20, %s2369_s23, %s2174_s11, %s2174_s11, %s2175_s19  }
  0x90 PF: > { %p2814_p12 = scmp.ne.s32.totalorder %s2809_s15, 0 }
  0x91   : > { %s2409_s21 = sand.u32 (!%p2814_p12), 1, %s2156_s25   ;;  %p2815_p7 = scmp.ne.s32.totalorder (!%p2814_p12), %s2805_s12, 0 }
  0x92   : > { %300 = sbr.rel (%p2814_p12) target bundleno = 1011 (0x3f3), region = 48  ;;  %s1587_s22 = sshll.u32 (!%p2814_p12), %s2409_s21, 9 }
  0x93   : > { %s303_s29 = scalar_lea.sflag (!%p2814_p12), [#allocation3], %s2409_s21  ;;  %s2415_s24 = scalar_lea.vmem (!%p2814_p12), [#allocation2], %s1587_s22 }
  0x99   : > { %2135 = dma.done.wait (%p2815_p7), %s303_s29, 8192  }
  0x9a   : > { %2137 = vsyncadd (%p2815_p7), %s303_s29, 4294959104  ;;  %p2816_p2 = scmp.eq.s32.totalorder %s2241_s28, 0 }
  0x9c   : > { %2139 = dma.done.wait (%p2816_p2), [#allocation6], 3072   ;;  %p2817_p8 = pmov %p2816_p2 }
  0x9d   : > { %p2818_p9 = pmov %p2816_p2 }
  0x9e   : > { %2141 = vsyncadd (%p2817_p8), [#allocation6], 4294964224 }
  0x9f   : > { %2143 = dma.done.wait (%p2818_p9), [#allocation9], 2048   ;;  %p2819_p10 = pmov %p2816_p2 }
  0xa0   : > { %v1930_v0 = vld [vmem:[#allocation5 + $0x40] sm:$0xff]   ;;  %v1932_v2 = vld [vmem:[#allocation5 + $0x48] sm:$0xff]   ;;  %v1934_v4 = vld [vmem:[#allocation5 + $0x50] sm:$0xff]   ;;  %s2594_s1 = scalar_lea.vmem [#allocation10], %s1587_s22  ;;  %s1448_s9 = scalar_lea.sflag [#allocation4], %s2409_s21 }
  0xa1   : > { %2145 = vsyncadd (%p2819_p10), [#allocation9], 4294965248  ;;  %v1931_v1 = vld [vmem:[#allocation5] sm:$0xff]   ;;  %1651 = vmatprep.subr.bf16.mxu0 %v1930_v0  ;;  %v1933_v3 = vld [vmem:[#allocation5 + $0x8] sm:$0xff]   ;;  %p2820_p1 = scmp.ne.s32.totalorder %s2806_s13, 0 }
  0xa2   : > { %1652 = vmatpush3.bf16.msra.mxu0 %v1931_v1  ;;  %v1935_v5 = vld [vmem:[#allocation5 + $0x10] sm:$0xff]   ;;  %v1936_v6 = vld [vmem:[#allocation5 + $0x58] sm:$0xff]   ;;  %v1938_v8 = vld [vmem:[#allocation5 + $0x60] sm:$0xff]   ;;  %s1635_s30 = sshll.u32 (%p2820_p1), %s2241_s28, 5 }
  0xa3   : > { %1653 = vmatprep.subr.bf16.mxu0 %v1932_v2  ;;  %v1937_v7 = vld [vmem:[#allocation5 + $0x18] sm:$0xff]   ;;  %v1939_v9 = vld [vmem:[#allocation5 + $0x20] sm:$0xff]   ;;  %v1940_v10 = vld [vmem:[#allocation5 + $0x68] sm:$0xff]   ;;  %s1456_s10 = ssub.s32 (%p2820_p1), 48, %s1635_s30 }
  0xa4   : > { %v363_v11 = vld [vmem:[%s2415_s24 + $0x8] sm:$0xff]  ;;  %v365_v12 = vld [vmem:[%s2415_s24 + $0x18] sm:$0xff]  ;;  %v1942_v15 = vld [vmem:[#allocation5 + $0x70] sm:$0xff]   ;;  %p1457_p3 = scmp.lt.s32.totalorder (%p2820_p1), %s1456_s10, 32 }
  0xa5   : > { %v427_v13 = vpack.c.bf16 %v365_v12, %v363_v11  ;;  %v1941_v14 = vld [vmem:[#allocation5 + $0x28] sm:$0xff]   ;;  %v1943_v16 = vld [vmem:[#allocation5 + $0x30] sm:$0xff]   ;;  %v1944_v17 = vld [vmem:[#allocation5 + $0x78] sm:$0xff]  }
  0xa6   : > { %1654 = vmatpush3.bf16.msra.mxu0 %v1933_v3  ;;  %v1945_v18 = vld [vmem:[#allocation5 + $0x38] sm:$0xff]   ;;  %v362_v19 = vld [vmem:[%s2415_s24] sm:$0xff]  ;;  %v364_v20 = vld [vmem:[%s2415_s24 + $0x10] sm:$0xff] }
  0xa7   : > { %1655 = vmatprep.subr.bf16.mxu0 %v1934_v4  ;;  %625 = vmatprep.mubr.bf16.mxu0 %v427_v13  ;;  %v367_v21 = vld [vmem:[%s2415_s24 + $0x28] sm:$0xff]  ;;  %v369_v22 = vld [vmem:[%s2415_s24 + $0x38] sm:$0xff]  ;;  %v426_v23 = vpack.c.bf16 %v364_v20, %v362_v19  ;;  %v1946_v25 = vld [vmem:[#allocation7] sm:$0xff]  }
  0xa8   : > { %v429_v24 = vpack.c.bf16 %v369_v22, %v367_v21  ;;  %v366_v26 = vld [vmem:[%s2415_s24 + $0x20] sm:$0xff]  ;;  %v368_v27 = vld [vmem:[%s2415_s24 + $0x30] sm:$0xff]  ;;  %v371_v28 = vld [vmem:[%s2415_s24 + $0x48] sm:$0xff]  ;;  %1835 = vmatprep.subr.bf16.mxu1 %v1946_v25 }
  0xa9   : > { %v373_v29 = vld [vmem:[%s2415_s24 + $0x58] sm:$0xff]  ;;  %v1947_v30 = vld [vmem:[#allocation7 + $0x8] sm:$0xff]   ;;  %1843 = vmatpush3.bf16.msra.mxu1 %v1946_v25  ;;  %v428_v31 = vpack.c.bf16 %v368_v27, %v366_v26  ;;  %v1948_v33 = vld [vmem:[#allocation7 + $0x10] sm:$0xff]  }
  0xaa   : > { %1656 = vmatpush3.bf16.msra.mxu0 %v1935_v5  ;;  %v431_v32 = vpack.c.bf16 %v373_v29, %v371_v28  ;;  %1836 = vmatprep.subr.bf16.mxu1 %v1947_v30  ;;  %v370_v34 = vld [vmem:[%s2415_s24 + $0x40] sm:$0xff]  ;;  %v372_v35 = vld [vmem:[%s2415_s24 + $0x50] sm:$0xff]  ;;  %v375_v36 = vld [vmem:[%s2415_s24 + $0x68] sm:$0xff] }
  0xab   : > { %1657 = vmatprep.subr.bf16.mxu0 %v1936_v6  ;;  %v1949_v37 = vld [vmem:[#allocation7 + $0x18] sm:$0xff]   ;;  %v1950_v39 = vld [vmem:[#allocation7 + $0x20] sm:$0xff]   ;;  %v430_v40 = vpack.c.bf16 %v372_v35, %v370_v34  ;;  %v1951_v42 = vld [vmem:[#allocation7 + $0x28] sm:$0xff]  }
  0xac   : > { %v377_v38 = vld [vmem:[%s2415_s24 + $0x78] sm:$0xff]  ;;  %v374_v43 = vld [vmem:[%s2415_s24 + $0x60] sm:$0xff]  ;;  %v376_v44 = vld [vmem:[%s2415_s24 + $0x70] sm:$0xff] }
  0xad   : > { %1844 = vmatpush3.bf16.msra.mxu1 %v1947_v30  ;;  %v433_v41 = vpack.c.bf16 %v377_v38, %v375_v36  ;;  %v379_v45 = vld [vmem:[%s2415_s24 + $0x88] sm:$0xff]  ;;  %v381_v46 = vld [vmem:[%s2415_s24 + $0x98] sm:$0xff]  ;;  %v432_v47 = vpack.c.bf16 %v376_v44, %v374_v43  ;;  %v1952_v48 = vld [vmem:[#allocation7 + $0x30] sm:$0xff]  }
  0xae   : > { %1658 = vmatpush3.bf16.msra.mxu0 %v1937_v7  ;;  %1837 = vmatprep.subr.bf16.mxu1 %v1948_v33  ;;  %v435_v49 = vpack.c.bf16 %v381_v46, %v379_v45  ;;  %v378_v50 = vld [vmem:[%s2415_s24 + $0x80] sm:$0xff]  ;;  %v380_v51 = vld [vmem:[%s2415_s24 + $0x90] sm:$0xff]  ;;  %v383_v52 = vld [vmem:[%s2415_s24 + $0xa8] sm:$0xff] }
  0xaf   : > { %1659 = vmatprep.subr.bf16.mxu0 %v1938_v8  ;;  %v385_v53 = vld [vmem:[%s2415_s24 + $0xb8] sm:$0xff]  ;;  %v434_v54 = vpack.c.bf16 %v380_v51, %v378_v50  ;;  %v382_v56 = vld [vmem:[%s2415_s24 + $0xa0] sm:$0xff]  ;;  %v384_v57 = vld [vmem:[%s2415_s24 + $0xb0] sm:$0xff] }
  0xb0   : > { %v437_v55 = vpack.c.bf16 %v385_v53, %v383_v52  ;;  %v387_v58 = vld [vmem:[%s2415_s24 + $0xc8] sm:$0xff]  ;;  %v389_v59 = vld [vmem:[%s2415_s24 + $0xd8] sm:$0xff]  ;;  %v436_v60 = vpack.c.bf16 %v384_v57, %v382_v56  ;;  %v386_v62 = vld [vmem:[%s2415_s24 + $0xc0] sm:$0xff] }
  0xb1   : > { %1845 = vmatpush3.bf16.msra.mxu1 %v1948_v33  ;;  %v439_v61 = vpack.c.bf16 %v389_v59, %v387_v58  ;;  %v388_v63 = vld [vmem:[%s2415_s24 + $0xd0] sm:$0xff]  ;;  %v391_v0 = vld [vmem:[%s2415_s24 + $0xe8] sm:$0xff]  ;;  %v393_v1 = vld [vmem:[%s2415_s24 + $0xf8] sm:$0xff] }
  0xb2   : > { %1660 = vmatpush3.bf16.msra.mxu0 %v1939_v9  ;;  %1838 = vmatprep.subr.bf16.mxu1 %v1949_v37  ;;  %v438_v2 = vpack.c.bf16 %v388_v63, %v386_v62  ;;  %v441_v3 = vpack.c.bf16 %v393_v1, %v391_v0  ;;  %v390_v4 = vld [vmem:[%s2415_s24 + $0xe0] sm:$0xff]  ;;  %v392_v5 = vld [vmem:[%s2415_s24 + $0xf0] sm:$0xff]  ;;  %v395_v6 = vld [vmem:[%s2415_s24 + $0x108] sm:$0xff] }
  0xb3   : > { %1661 = vmatprep.subr.bf16.mxu0 %v1940_v10  ;;  %v397_v7 = vld [vmem:[%s2415_s24 + $0x118] sm:$0xff]  ;;  %v440_v8 = vpack.c.bf16 %v392_v5, %v390_v4  ;;  %v394_v10 = vld [vmem:[%s2415_s24 + $0x100] sm:$0xff]  ;;  %v396_v11 = vld [vmem:[%s2415_s24 + $0x110] sm:$0xff] }
  0xb4   : > { %v443_v9 = vpack.c.bf16 %v397_v7, %v395_v6  ;;  %v399_v12 = vld [vmem:[%s2415_s24 + $0x128] sm:$0xff]  ;;  %v401_v13 = vld [vmem:[%s2415_s24 + $0x138] sm:$0xff]  ;;  %v402_v22 = vld [vmem:[%s2415_s24 + $0x140] sm:$0xff] }
  0xb5   : > { %1846 = vmatpush3.bf16.msra.mxu1 %v1949_v37  ;;  %v405_v19 = vld [vmem:[%s2415_s24 + $0x158] sm:$0xff]  ;;  %v406_v28 = vld [vmem:[%s2415_s24 + $0x160] sm:$0xff]  ;;  %v408_v29 = vld [vmem:[%s2415_s24 + $0x170] sm:$0xff] }
  0xb6   : > { %1662 = vmatpush3.bf16.msra.mxu0 %v1941_v14  ;;  %1839 = vmatprep.subr.bf16.mxu1 %v1950_v39  ;;  %v442_v14 = vpack.c.bf16 %v396_v11, %v394_v10  ;;  %v410_v34 = vld [vmem:[%s2415_s24 + $0x180] sm:$0xff]  ;;  %v412_v35 = vld [vmem:[%s2415_s24 + $0x190] sm:$0xff]  ;;  %v415_v36 = vld [vmem:[%s2415_s24 + $0x1a8] sm:$0xff] }
  0xb7   : > { %1663 = vmatprep.subr.bf16.mxu0 %v1942_v15  ;;  %v445_v15 = vpack.c.bf16 %v401_v13, %v399_v12  ;;  %v1953_v38 = vld [vmem:[#allocation7 + $0x38] sm:$0xff]   ;;  %v419_v43 = vld [vmem:[%s2415_s24 + $0x1c8] sm:$0xff]  ;;  %v422_v53 = vld [vmem:[%s2415_s24 + $0x1e0] sm:$0xff] }
  0xb8   : > { %v421_v44 = vld [vmem:[%s2415_s24 + $0x1d8] sm:$0xff]  ;;  %v2496_v57 = vld [vmem:[%s2787_s2] ss:$0 sm:$0xff]  ;;  %v1956_v0 = vld [vmem:[#allocation8 + $0x4] ss:$8 sps:$4 sm:$0xff]  }
  0xb9   : > { %1847 = vmatpush3.bf16.msra.mxu1 %v1950_v39  ;;  %v455_v46 = vpack.c.bf16 %v421_v44, %v419_v43  ;;  %v425_v50 = vld [vmem:[%s2415_s24 + $0x1f8] sm:$0xff] }
  0xba   : > { %1664 = vmatpush3.bf16.msra.mxu0 %v1943_v16  ;;  %1840 = vmatprep.subr.bf16.mxu1 %v1951_v42  ;;  %v398_v16 = vld [vmem:[%s2415_s24 + $0x120] sm:$0xff] }
  0xbb   : > { %1665 = vmatprep.subr.bf16.mxu0 %v1944_v17  ;;  %v400_v17 = vld [vmem:[%s2415_s24 + $0x130] sm:$0xff] }
  0xbc   : > { %v444_v20 = vpack.c.bf16 %v400_v17, %v398_v16 }
  0xbd   : > { %1848 = vmatpush3.bf16.msra.mxu1 %v1951_v42 }
  0xbe   : > { %1666 = vmatpush3.bf16.msra.mxu0 %v1945_v18  ;;  %1841 = vmatprep.subr.bf16.mxu1 %v1952_v48  ;;  %v403_v18 = vld [vmem:[%s2415_s24 + $0x148] sm:$0xff] }
  0xbf   : > { %1787 = vmatprep.subr.bf16.mxu0 %v1946_v25  ;;  %v447_v21 = vpack.c.bf16 %v405_v19, %v403_v18 }
  0xc1   : > { %626 = vmatmul.mubr.bf16.vlgmr.msra.gmra.mrb[0].mxu0 %v426_v23  ;;  %1849 = vmatpush3.bf16.msra.mxu1 %v1952_v48  ;;  %v404_v23 = vld [vmem:[%s2415_s24 + $0x150] sm:$0xff] }
  0xc2   : > { %633 = vmatprep.mubr.bf16.mxu0 %v429_v24  ;;  %1788 = vmatpush3.bf16.msra.mxu0 %v1946_v25  ;;  %v407_v24 = vld [vmem:[%s2415_s24 + $0x168] sm:$0xff]  ;;  %v409_v25 = vld [vmem:[%s2415_s24 + $0x178] sm:$0xff]  ;;  %v446_v26 = vpack.c.bf16 %v404_v23, %v402_v22 }
  0xc3   : > { %1789 = vmatprep.subr.bf16.mxu0 %v1947_v30  ;;  %v449_v27 = vpack.c.bf16 %v409_v25, %v407_v24  ;;  %1842 = vmatprep.subr.bf16.mxu1 %v1953_v38 }
  0xc5   : > { %1850 = vmatpush3.bf16.msra.mxu1 %v1953_v38 }
  0xc6   : > { %1790 = vmatpush3.bf16.msra.mxu0 %v1947_v30  ;;  %v411_v30 = vld [vmem:[%s2415_s24 + $0x188] sm:$0xff]  ;;  %1190 = vmatprep.subr.bf16.mxu1 %v1956_v0 }
  0xc7   : > { %1791 = vmatprep.subr.bf16.mxu0 %v1948_v33 }
  0xc9   : > { %634 = vmatmul.mubr.bf16.gmra.mrb[4].mxu0 %v428_v31  ;;  %v413_v31 = vld [vmem:[%s2415_s24 + $0x198] sm:$0xff] }
  0xca   : > { %641 = vmatprep.mubr.bf16.mxu0 %v431_v32  ;;  %1792 = vmatpush3.bf16.msra.mxu0 %v1948_v33  ;;  %v448_v32 = vpack.c.bf16 %v408_v29, %v406_v28  ;;  %v451_v33 = vpack.c.bf16 %v413_v31, %v411_v30 }
  0xcb   : > { %1793 = vmatprep.subr.bf16.mxu0 %v1949_v37 }
  0xce   : > { %1794 = vmatpush3.bf16.msra.mxu0 %v1949_v37  ;;  %v417_v37 = vld [vmem:[%s2415_s24 + $0x1b8] sm:$0xff] }
  0xcf   : > { %1795 = vmatprep.subr.bf16.mxu0 %v1950_v39 }
  0xd1   : > { %642 = vmatmul.mubr.bf16.gmra.mrb[8].mxu0 %v430_v40  ;;  %v453_v40 = vpack.c.bf16 %v417_v37, %v415_v36 }
  0xd2   : > { %649 = vmatprep.mubr.bf16.mxu0 %v433_v41  ;;  %1796 = vmatpush3.bf16.msra.mxu0 %v1950_v39  ;;  %v450_v39 = vpack.c.bf16 %v412_v35, %v410_v34  ;;  %v414_v41 = vld [vmem:[%s2415_s24 + $0x1a0] sm:$0xff] }
  0xd3   : > { %1797 = vmatprep.subr.bf16.mxu0 %v1951_v42 }
  0xd6   : > { %1798 = vmatpush3.bf16.msra.mxu0 %v1951_v42  ;;  %v416_v42 = vld [vmem:[%s2415_s24 + $0x1b0] sm:$0xff] }
  0xd7   : > { %1799 = vmatprep.subr.bf16.mxu0 %v1952_v48  ;;  %v452_v45 = vpack.c.bf16 %v416_v42, %v414_v41 }
  0xd9   : > { %650 = vmatmul.mubr.bf16.gmra.mrb[12].mxu0 %v432_v47  ;;  %v418_v47 = vld [vmem:[%s2415_s24 + $0x1c0] sm:$0xff] }
  0xda   : > { %657 = vmatprep.mubr.bf16.mxu0 %v435_v49  ;;  %1800 = vmatpush3.bf16.msra.mxu0 %v1952_v48  ;;  %v420_v48 = vld [vmem:[%s2415_s24 + $0x1d0] sm:$0xff]  ;;  %v423_v49 = vld [vmem:[%s2415_s24 + $0x1e8] sm:$0xff] }
  0xdb   : > { %1801 = vmatprep.subr.bf16.mxu0 %v1953_v38  ;;  %v454_v51 = vpack.c.bf16 %v420_v48, %v418_v47  ;;  %v457_v52 = vpack.c.bf16 %v425_v50, %v423_v49 }
  0xde   : > { %1802 = vmatpush3.bf16.msra.mxu0 %v1953_v38 }
  0xe1   : > { %658 = vmatmul.mubr.bf16.gmra.mrb[16].mxu0 %v434_v54  ;;  %v424_v54 = vld [vmem:[%s2415_s24 + $0x1f0] sm:$0xff] }
  0xe2   : > { %665 = vmatprep.mubr.bf16.mxu0 %v437_v55  ;;  %v456_v55 = vpack.c.bf16 %v424_v54, %v422_v53 }
  0xe9   : > { %666 = vmatmul.mubr.bf16.gmra.mrb[20].mxu0 %v436_v60 }
  0xea   : > { %673 = vmatprep.mubr.bf16.mxu0 %v439_v61 }
  0xf1   : > { %674 = vmatmul.mubr.bf16.gmra.mrb[24].mxu0 %v438_v2 }
  0xf2   : > { %681 = vmatprep.mubr.bf16.mxu0 %v441_v3 }
  0xf9   : > { %682 = vmatmul.mubr.bf16.gmra.mrb[28].mxu0 %v440_v8 }
  0xfa   : > { %689 = vmatprep.mubr.bf16.mxu0 %v443_v9 }
 0x101   : > { %690 = vmatmul.mubr.bf16.gmra.mrb[32].mxu0 %v442_v14 }
 0x102   : > { %697 = vmatprep.mubr.bf16.mxu0 %v445_v15 }
 0x109   : > { %698 = vmatmul.mubr.bf16.gmra.mrb[36].mxu0 %v444_v20 }
 0x10a   : > { %705 = vmatprep.mubr.bf16.mxu0 %v447_v21 }
 0x111   : > { %706 = vmatmul.mubr.bf16.gmra.mrb[40].mxu0 %v446_v26 }
 0x112   : > { %713 = vmatprep.mubr.bf16.mxu0 %v449_v27 }
 0x119   : > { %714 = vmatmul.mubr.bf16.gmra.mrb[44].mxu0 %v448_v32 }
 0x11a   : > { %721 = vmatprep.mubr.bf16.mxu0 %v451_v33 }
 0x121   : > { %722 = vmatmul.mubr.bf16.gmra.mrb[48].mxu0 %v450_v39 }
 0x122   : > { %729 = vmatprep.mubr.bf16.mxu0 %v453_v40 }
 0x129   : > { %730 = vmatmul.mubr.bf16.gmra.mrb[52].mxu0 %v452_v45 }
 0x12a   : > { %737 = vmatprep.mubr.bf16.mxu0 %v455_v46 }
 0x131   : > { %738 = vmatmul.mubr.bf16.gmra.mrb[56].mxu0 %v454_v51 }
 0x132   : > { %745 = vmatprep.mubr.bf16.mxu0 %v457_v52 }
 0x139   : > { %746 = vmatmul.mubr.bf16.gmra.mrb[60].mxu0 %v456_v55 }
 0x194   : > { %v1667_v56 = vpop.f32.mrb[0].mxu0 }
 0x195   : > { %v1668_v58 = vpop.f32.mrb[1].mxu0 }
 0x196   : > { %v1669_v59 = vadd.f32 %v1668_v58, %v1667_v56  ;;  %v1670_v60 = vpop.f32.mrb[2].mxu0 }
 0x197   : > { %v1671_v61 = vpop.f32.mrb[3].mxu0 }
 0x198   : > { %v628_v62 = vadd.f32 %v1669_v59, %v2496_v57  ;;  %v1672_v63 = vadd.f32 %v1671_v61, %v1670_v60 }
 0x19a   : > { %v631_v1 = vadd.f32 %v1672_v63, %v2496_v57  ;;  %v754_v2 = vmax.f32 %v628_v62, 0.0 }
 0x19c   : > { %v755_v3 = vmax.f32 %v631_v1, 0.0  ;;  %v1673_v4 = vpop.f32.mrb[4].mxu0 }
 0x19d   : > { %v1674_v5 = vpop.f32.mrb[5].mxu0 }
 0x19e   : > { %v1675_v6 = vadd.f32 %v1674_v5, %v1673_v4  ;;  %v1676_v7 = vpop.f32.mrb[6].mxu0  ;;  %v786_v8 = vpack.c.bf16 %v755_v3, %v754_v2 }
 0x19f   : > { %v1677_v9 = vpop.f32.mrb[7].mxu0 }
 0x1a0   : > { %v636_v10 = vadd.f32 %v1675_v6, %v2496_v57  ;;  %v1678_v11 = vadd.f32 %v1677_v9, %v1676_v7  ;;  %1803 = vmatprep.mubr.bf16.mxu0 %v786_v8 }
 0x1a2   : > { %v639_v12 = vadd.f32 %v1678_v11, %v2496_v57  ;;  %v756_v13 = vmax.f32 %v636_v10, 0.0 }
 0x1a4   : > { %v757_v14 = vmax.f32 %v639_v12, 0.0  ;;  %v1679_v15 = vpop.f32.mrb[8].mxu0 }
 0x1a5   : > { %v1680_v16 = vpop.f32.mrb[9].mxu0 }
 0x1a6   : > { %v787_v17 = vpack.c.bf16 %v757_v14, %v756_v13  ;;  %v1681_v18 = vadd.f32 %v1680_v16, %v1679_v15  ;;  %v1682_v19 = vpop.f32.mrb[10].mxu0 }
 0x1a7   : > { %v1683_v20 = vpop.f32.mrb[11].mxu0 }
 0x1a8   : > { %v644_v21 = vadd.f32 %v1681_v18, %v2496_v57  ;;  %v1684_v22 = vadd.f32 %v1683_v20, %v1682_v19  ;;  %1804 = vmatmul.mubr.bf16.vlgmr.msra.gmra.mrb[64].mxu0 %v787_v17 }
 0x1aa   : > { %v647_v23 = vadd.f32 %v1684_v22, %v2496_v57  ;;  %v758_v24 = vmax.f32 %v644_v21, 0.0 }
 0x1ac   : > { %v759_v25 = vmax.f32 %v647_v23, 0.0  ;;  %v1685_v26 = vpop.f32.mrb[12].mxu0 }
 0x1ad   : > { %v1686_v27 = vpop.f32.mrb[13].mxu0 }
 0x1ae   : > { %v1687_v28 = vadd.f32 %v1686_v27, %v1685_v26  ;;  %v1688_v29 = vpop.f32.mrb[14].mxu0  ;;  %v788_v30 = vpack.c.bf16 %v759_v25, %v758_v24 }
 0x1af   : > { %v1689_v31 = vpop.f32.mrb[15].mxu0 }
 0x1b0   : > { %v652_v32 = vadd.f32 %v1687_v28, %v2496_v57  ;;  %v1690_v33 = vadd.f32 %v1689_v31, %v1688_v29  ;;  %1807 = vmatprep.mubr.bf16.mxu0 %v788_v30 }
 0x1b2   : > { %v655_v34 = vadd.f32 %v1690_v33, %v2496_v57  ;;  %v760_v35 = vmax.f32 %v652_v32, 0.0 }
 0x1b4   : > { %v761_v36 = vmax.f32 %v655_v34, 0.0  ;;  %v1691_v37 = vpop.f32.mrb[16].mxu0 }
 0x1b5   : > { %v1692_v38 = vpop.f32.mrb[17].mxu0 }
 0x1b6   : > { %v1693_v39 = vadd.f32 %v1692_v38, %v1691_v37  ;;  %v1694_v40 = vpop.f32.mrb[18].mxu0  ;;  %v789_v41 = vpack.c.bf16 %v761_v36, %v760_v35 }
 0x1b7   : > { %v1695_v42 = vpop.f32.mrb[19].mxu0 }
 0x1b8   : > { %v660_v43 = vadd.f32 %v1693_v39, %v2496_v57  ;;  %v1696_v44 = vadd.f32 %v1695_v42, %v1694_v40  ;;  %1808 = vmatmul.mubr.bf16.gmra.mrb[68].mxu0 %v789_v41  ;;  %v1954_v42 = vld [vmem:[#allocation8] ss:$8 sps:$4 sm:$0xff]  }
 0x1ba   : > { %v663_v45 = vadd.f32 %v1696_v44, %v2496_v57  ;;  %v762_v46 = vmax.f32 %v660_v43, 0.0 }
 0x1bc   : > { %v763_v47 = vmax.f32 %v663_v45, 0.0  ;;  %v1697_v48 = vpop.f32.mrb[20].mxu0 }
 0x1bd   : > { %v1698_v49 = vpop.f32.mrb[21].mxu0 }
 0x1be   : > { %v1699_v50 = vadd.f32 %v1698_v49, %v1697_v48  ;;  %v1700_v51 = vpop.f32.mrb[22].mxu0  ;;  %v790_v52 = vpack.c.bf16 %v763_v47, %v762_v46  ;;  %v1959_v46 = vld [vmem:[#allocation8 + $0x14] ss:$8 sps:$4 sm:$0xff]  }
 0x1bf   : > { %v1701_v53 = vpop.f32.mrb[23].mxu0 }
 0x1c0   : > { %v668_v54 = vadd.f32 %v1699_v50, %v2496_v57  ;;  %v1702_v55 = vadd.f32 %v1701_v53, %v1700_v51  ;;  %1811 = vmatprep.mubr.bf16.mxu0 %v790_v52  ;;  %v1957_v50 = vld [vmem:[#allocation8 + $0x10] ss:$8 sps:$4 sm:$0xff]   ;;  %v1962_v52 = vld [vmem:[#allocation8 + $0x24] ss:$8 sps:$4 sm:$0xff]  }
 0x1c2   : > { %v671_v56 = vadd.f32 %v1702_v55, %v2496_v57  ;;  %v764_v58 = vmax.f32 %v668_v54, 0.0 }
 0x1c4   : > { %v765_v59 = vmax.f32 %v671_v56, 0.0  ;;  %v1703_v60 = vpop.f32.mrb[24].mxu0 }
 0x1c5   : > { %v1704_v61 = vpop.f32.mrb[25].mxu0 }
 0x1c6   : > { %v1705_v62 = vadd.f32 %v1704_v61, %v1703_v60  ;;  %v1706_v63 = vpop.f32.mrb[26].mxu0  ;;  %v791_v0 = vpack.c.bf16 %v765_v59, %v764_v58  ;;  %v1960_v58 = vld [vmem:[#allocation8 + $0x20] ss:$8 sps:$4 sm:$0xff]  }
 0x1c7   : > { %v1707_v1 = vpop.f32.mrb[27].mxu0 }
 0x1c8   : > { %v676_v2 = vadd.f32 %v1705_v62, %v2496_v57  ;;  %v1708_v3 = vadd.f32 %v1707_v1, %v1706_v63  ;;  %1812 = vmatmul.mubr.bf16.gmra.mrb[72].mxu0 %v791_v0  ;;  %v1965_v62 = vld [vmem:[#allocation8 + $0x34] ss:$8 sps:$4 sm:$0xff]  }
 0x1ca   : > { %v679_v4 = vadd.f32 %v1708_v3, %v2496_v57  ;;  %v766_v5 = vmax.f32 %v676_v2, 0.0  ;;  %v1963_v2 = vld [vmem:[#allocation8 + $0x30] ss:$8 sps:$4 sm:$0xff]  }
 0x1cc   : > { %v767_v6 = vmax.f32 %v679_v4, 0.0  ;;  %v1709_v7 = vpop.f32.mrb[28].mxu0  ;;  %v1968_v4 = vld [vmem:[#allocation8 + $0x44] ss:$8 sps:$4 sm:$0xff]  }
 0x1cd   : > { %v1710_v8 = vpop.f32.mrb[29].mxu0 }
 0x1ce   : > { %v1711_v9 = vadd.f32 %v1710_v8, %v1709_v7  ;;  %v1712_v10 = vpop.f32.mrb[30].mxu0  ;;  %v792_v11 = vpack.c.bf16 %v767_v6, %v766_v5 }
 0x1cf   : > { %v1713_v12 = vpop.f32.mrb[31].mxu0 }
 0x1d0   : > { %v684_v13 = vadd.f32 %v1711_v9, %v2496_v57  ;;  %v1714_v14 = vadd.f32 %v1713_v12, %v1712_v10  ;;  %1815 = vmatprep.mubr.bf16.mxu0 %v792_v11  ;;  %v1966_v9 = vld [vmem:[#allocation8 + $0x40] ss:$8 sps:$4 sm:$0xff]  }
 0x1d2   : > { %v687_v15 = vadd.f32 %v1714_v14, %v2496_v57  ;;  %v768_v16 = vmax.f32 %v684_v13, 0.0  ;;  %v1971_v13 = vld [vmem:[#allocation8 + $0x54] ss:$8 sps:$4 sm:$0xff]  }
 0x1d4   : > { %v769_v17 = vmax.f32 %v687_v15, 0.0  ;;  %v1715_v18 = vpop.f32.mrb[32].mxu0 }
 0x1d5   : > { %v1716_v19 = vpop.f32.mrb[33].mxu0 }
 0x1d6   : > { %v1717_v20 = vadd.f32 %v1716_v19, %v1715_v18  ;;  %v1718_v21 = vpop.f32.mrb[34].mxu0  ;;  %v793_v22 = vpack.c.bf16 %v769_v17, %v768_v16  ;;  %v1969_v17 = vld [vmem:[#allocation8 + $0x50] ss:$8 sps:$4 sm:$0xff]   ;;  %v1974_v19 = vld [vmem:[#allocation8 + $0x64] ss:$8 sps:$4 sm:$0xff]  }
 0x1d7   : > { %v1719_v23 = vpop.f32.mrb[35].mxu0 }
 0x1d8   : > { %v1720_v24 = vadd.f32 %v1719_v23, %v1718_v21  ;;  %1816 = vmatmul.mubr.bf16.gmra.mrb[76].mxu0 %v793_v22  ;;  %v692_v25 = vadd.f32 %v1717_v20, %v2496_v57 }
 0x1da   : > { %v695_v26 = vadd.f32 %v1720_v24, %v2496_v57  ;;  %v770_v28 = vmax.f32 %v692_v25, 0.0  ;;  %v1972_v24 = vld [vmem:[#allocation8 + $0x60] ss:$8 sps:$4 sm:$0xff]  }
 0x1dc   : > { %v1721_v27 = vpop.f32.mrb[36].mxu0  ;;  %v771_v29 = vmax.f32 %v695_v26, 0.0 }
 0x1dd   : > { %v1722_v30 = vpop.f32.mrb[37].mxu0 }
 0x1de   : > { %v1723_v31 = vadd.f32 %v1722_v30, %v1721_v27  ;;  %v1724_v32 = vpop.f32.mrb[38].mxu0  ;;  %v794_v33 = vpack.c.bf16 %v771_v29, %v770_v28  ;;  %v1977_v29 = vld [vmem:[#allocation8 + $0x74] ss:$8 sps:$4 sm:$0xff]  }
 0x1df   : > { %v1725_v34 = vpop.f32.mrb[39].mxu0 }
 0x1e0   : > { %v700_v35 = vadd.f32 %v1723_v31, %v2496_v57  ;;  %v1726_v36 = vadd.f32 %v1725_v34, %v1724_v32  ;;  %1819 = vmatprep.mubr.bf16.mxu1 %v794_v33  ;;  %v1975_v32 = vld [vmem:[#allocation8 + $0x70] ss:$8 sps:$4 sm:$0xff]  }
 0x1e2   : > { %v703_v37 = vadd.f32 %v1726_v36, %v2496_v57  ;;  %v772_v38 = vmax.f32 %v700_v35, 0.0 }
 0x1e4   : > { %v773_v39 = vmax.f32 %v703_v37, 0.0  ;;  %v1727_v40 = vpop.f32.mrb[40].mxu0 }
 0x1e5   : > { %v1728_v41 = vpop.f32.mrb[41].mxu0 }
 0x1e6   : > { %v1729_v43 = vadd.f32 %v1728_v41, %v1727_v40  ;;  %v1730_v44 = vpop.f32.mrb[42].mxu0  ;;  %v795_v45 = vpack.c.bf16 %v773_v39, %v772_v38 }
 0x1e7   : > { %v1731_v47 = vpop.f32.mrb[43].mxu0 }
 0x1e8   : > { %v708_v48 = vadd.f32 %v1729_v43, %v2496_v57  ;;  %v1732_v49 = vadd.f32 %v1731_v47, %v1730_v44  ;;  %1820 = vmatmul.mubr.bf16.vlgmr.msra.gmra.mrb[0].mxu1 %v795_v45 }
 0x1e9   : > { %1191 = vmatpush1.bf16.msra.mxu1 %v1954_v42 }
 0x1ea   : > { %v711_v51 = vadd.f32 %v1732_v49, %v2496_v57  ;;  %1192 = vmatprep.subr.bf16.mxu1 %v1959_v46  ;;  %v774_v53 = vmax.f32 %v708_v48, 0.0 }
 0x1ec   : > { %v775_v54 = vmax.f32 %v711_v51, 0.0  ;;  %v1733_v55 = vpop.f32.mrb[44].mxu0 }
 0x1ed   : > { %v1734_v56 = vpop.f32.mrb[45].mxu0  ;;  %1193 = vmatpush1.bf16.msra.mxu1 %v1957_v50 }
 0x1ee   : > { %v1735_v59 = vadd.f32 %v1734_v56, %v1733_v55  ;;  %v1736_v60 = vpop.f32.mrb[46].mxu0  ;;  %v796_v61 = vpack.c.bf16 %v775_v54, %v774_v53  ;;  %1194 = vmatprep.subr.bf16.mxu1 %v1962_v52 }
 0x1ef   : > { %v1737_v63 = vpop.f32.mrb[47].mxu0 }
 0x1f0   : > { %v716_v0 = vadd.f32 %v1735_v59, %v2496_v57  ;;  %v1738_v1 = vadd.f32 %v1737_v63, %v1736_v60  ;;  %1823 = vmatprep.mubr.bf16.mxu1 %v796_v61  ;;  %v2176_v60 = vmov 0   ;;  %v2534_v61 = vld [vmem:[%s2789_s4] ss:$0 sm:$0xff] }
 0x1f1   : > { %1195 = vmatpush1.bf16.msra.mxu1 %v1960_v58 }
 0x1f2   : > { %v719_v3 = vadd.f32 %v1738_v1, %v2496_v57  ;;  %1196 = vmatprep.subr.bf16.mxu1 %v1965_v62  ;;  %v776_v5 = vmax.f32 %v716_v0, 0.0 }
 0x1f4   : > { %v777_v6 = vmax.f32 %v719_v3, 0.0  ;;  %v1739_v7 = vpop.f32.mrb[48].mxu0 }
 0x1f5   : > { %v1740_v8 = vpop.f32.mrb[49].mxu0  ;;  %1197 = vmatpush1.bf16.msra.mxu1 %v1963_v2 }
 0x1f6   : > { %v1741_v10 = vadd.f32 %v1740_v8, %v1739_v7  ;;  %v1742_v11 = vpop.f32.mrb[50].mxu0  ;;  %v797_v12 = vpack.c.bf16 %v777_v6, %v776_v5  ;;  %1198 = vmatprep.subr.bf16.mxu1 %v1968_v4 }
 0x1f7   : > { %v1743_v14 = vpop.f32.mrb[51].mxu0 }
 0x1f8   : > { %v724_v15 = vadd.f32 %v1741_v10, %v2496_v57  ;;  %v1744_v16 = vadd.f32 %v1743_v14, %v1742_v11  ;;  %1824 = vmatmul.mubr.bf16.gmra.mrb[4].mxu1 %v797_v12 }
 0x1f9   : > { %1199 = vmatpush1.bf16.msra.mxu1 %v1966_v9 }
 0x1fa   : > { %v727_v18 = vadd.f32 %v1744_v16, %v2496_v57  ;;  %1200 = vmatprep.subr.bf16.mxu1 %v1971_v13  ;;  %v778_v20 = vmax.f32 %v724_v15, 0.0 }
 0x1fc   : > { %v779_v21 = vmax.f32 %v727_v18, 0.0  ;;  %v1745_v22 = vpop.f32.mrb[52].mxu0 }
 0x1fd   : > { %v1746_v23 = vpop.f32.mrb[53].mxu0  ;;  %1201 = vmatpush1.bf16.msra.mxu1 %v1969_v17 }
 0x1fe   : > { %v1747_v25 = vadd.f32 %v1746_v23, %v1745_v22  ;;  %v1748_v26 = vpop.f32.mrb[54].mxu0  ;;  %v798_v27 = vpack.c.bf16 %v779_v21, %v778_v20  ;;  %1202 = vmatprep.subr.bf16.mxu1 %v1974_v19 }
 0x1ff   : > { %v1749_v28 = vpop.f32.mrb[55].mxu0 }
 0x200   : > { %v732_v30 = vadd.f32 %v1747_v25, %v2496_v57  ;;  %v1750_v31 = vadd.f32 %v1749_v28, %v1748_v26  ;;  %1827 = vmatprep.mubr.bf16.mxu1 %v798_v27 }
 0x201   : > { %1203 = vmatpush1.bf16.msra.mxu1 %v1972_v24 }
 0x202   : > { %v735_v33 = vadd.f32 %v1750_v31, %v2496_v57  ;;  %1204 = vmatprep.subr.bf16.mxu1 %v1977_v29  ;;  %v780_v34 = vmax.f32 %v732_v30, 0.0 }
 0x204   : > { %v781_v35 = vmax.f32 %v735_v33, 0.0  ;;  %v1751_v36 = vpop.f32.mrb[56].mxu0 }
 0x205   : > { %v1752_v37 = vpop.f32.mrb[57].mxu0  ;;  %1205 = vmatpush1.bf16.msra.mxu1 %v1975_v32 }
 0x206   : > { %v1753_v38 = vadd.f32 %v1752_v37, %v1751_v36  ;;  %v1754_v39 = vpop.f32.mrb[58].mxu0  ;;  %v799_v40 = vpack.c.bf16 %v781_v35, %v780_v34 }
 0x207   : > { %v1755_v41 = vpop.f32.mrb[59].mxu0 }
 0x208   : > { %v740_v42 = vadd.f32 %v1753_v38, %v2496_v57  ;;  %v1756_v43 = vadd.f32 %v1755_v41, %v1754_v39  ;;  %1828 = vmatmul.mubr.bf16.gmra.mrb[8].mxu1 %v799_v40 }
 0x20a   : > { %v743_v44 = vadd.f32 %v1756_v43, %v2496_v57  ;;  %v782_v45 = vmax.f32 %v740_v42, 0.0 }
 0x20c   : > { %v783_v46 = vmax.f32 %v743_v44, 0.0  ;;  %v1757_v47 = vpop.f32.mrb[60].mxu0 }
 0x20d   : > { %v1758_v48 = vpop.f32.mrb[61].mxu0 }
 0x20e   : > { %v1759_v49 = vadd.f32 %v1758_v48, %v1757_v47  ;;  %v1760_v50 = vpop.f32.mrb[62].mxu0  ;;  %v800_v51 = vpack.c.bf16 %v783_v46, %v782_v45 }
 0x20f   : > { %v1761_v52 = vpop.f32.mrb[63].mxu0 }
 0x210   : > { %v748_v53 = vadd.f32 %v1759_v49, %v2496_v57  ;;  %v1762_v54 = vadd.f32 %v1761_v52, %v1760_v50  ;;  %1831 = vmatprep.mubr.bf16.mxu1 %v800_v51 }
 0x212   : > { %v751_v55 = vadd.f32 %v1762_v54, %v2496_v57  ;;  %v784_v56 = vmax.f32 %v748_v53, 0.0 }
 0x214   : > { %v785_v58 = vmax.f32 %v751_v55, 0.0 }
 0x216   : > { %v801_v59 = vpack.c.bf16 %v785_v58, %v784_v56 }
 0x218   : > { %1832 = vmatmul.mubr.bf16.gmra.mrb[12].mxu1 %v801_v59 }
 0x219   : > { %1222 = vmatprep.mubr.bf16.mxu1 %v2176_v60 }
 0x27b   : > { %v1805_v62 = vpop.f32.mrb[64].mxu0 }
 0x27c   : > { %v916_v63 = vadd.f32 %v1805_v62, %v2534_v61  ;;  %v907_v0 = vpop.f32.mrb[65].mxu0 }
 0x27d   : > { %v908_v1 = vadd.f32 %v2534_v61, %v907_v0  ;;  %v1806_v2 = vpop.f32.mrb[66].mxu0 }
 0x27e   : > { %v919_v57 = vadd.f32 %v1806_v2, %v2534_v61  ;;  %v910_v3 = vpop.f32.mrb[67].mxu0  ;;  %v1036_v5 = vmax.f32 %v916_v63, 0.0 }
 0x27f   : > { %v911_v4 = vadd.f32 %v2534_v61, %v910_v3  ;;  %v1034_v7 = vmax.f32 %v908_v1, 0.0 }
 0x280   : > { %v1037_v6 = vmax.f32 %v919_v57, 0.0 }
 0x281   : > { %v1035_v8 = vmax.f32 %v911_v4, 0.0 }
 0x282   : > { %v1067_v9 = vpack.c.bf16 %v1037_v6, %v1036_v5 }
 0x283   : > { %v1066_v10 = vpack.c.bf16 %v1035_v8, %v1034_v7 }
 0x285   : > { %1223 = vmatmul.mubr.bf16.vlgmr.msra.gmra.mrb[16].mxu1 %v1066_v10 }
 0x286   : > { %1232 = vmatprep.mubr.bf16.mxu1 %v2176_v60 }
 0x28b   : > { %v1809_v11 = vpop.f32.mrb[68].mxu0 }
 0x28c   : > { %v932_v12 = vadd.f32 %v1809_v11, %v2534_v61  ;;  %v923_v13 = vpop.f32.mrb[69].mxu0 }
 0x28d   : > { %v924_v14 = vadd.f32 %v2534_v61, %v923_v13  ;;  %v1810_v15 = vpop.f32.mrb[70].mxu0  ;;  %1233 = vmatmul.mubr.bf16.gmra.mrb[20].mxu1 %v1067_v9 }
 0x28e   : > { %v935_v16 = vadd.f32 %v1810_v15, %v2534_v61  ;;  %v926_v17 = vpop.f32.mrb[71].mxu0  ;;  %1242 = vmatprep.mubr.bf16.mxu1 %v2176_v60  ;;  %v1040_v19 = vmax.f32 %v932_v12, 0.0 }
 0x28f   : > { %v927_v18 = vadd.f32 %v2534_v61, %v926_v17  ;;  %v1038_v21 = vmax.f32 %v924_v14, 0.0 }
 0x290   : > { %v1041_v20 = vmax.f32 %v935_v16, 0.0 }
 0x291   : > { %v1039_v22 = vmax.f32 %v927_v18, 0.0 }
 0x292   : > { %v1069_v23 = vpack.c.bf16 %v1041_v20, %v1040_v19 }
 0x293   : > { %v1068_v24 = vpack.c.bf16 %v1039_v22, %v1038_v21 }
 0x295   : > { %1243 = vmatmul.mubr.bf16.gmra.mrb[24].mxu1 %v1068_v24 }
 0x296   : > { %1252 = vmatprep.mubr.bf16.mxu1 %v2176_v60 }
 0x29b   : > { %v1813_v25 = vpop.f32.mrb[72].mxu0 }
 0x29c   : > { %v948_v26 = vadd.f32 %v1813_v25, %v2534_v61  ;;  %v939_v27 = vpop.f32.mrb[73].mxu0 }
 0x29d   : > { %v940_v28 = vadd.f32 %v2534_v61, %v939_v27  ;;  %v1814_v29 = vpop.f32.mrb[74].mxu0  ;;  %1253 = vmatmul.mubr.bf16.gmra.mrb[28].mxu1 %v1069_v23 }
 0x29e   : > { %v951_v30 = vadd.f32 %v1814_v29, %v2534_v61  ;;  %v942_v31 = vpop.f32.mrb[75].mxu0  ;;  %1262 = vmatprep.mubr.bf16.mxu1 %v2176_v60  ;;  %v1044_v33 = vmax.f32 %v948_v26, 0.0 }
 0x29f   : > { %v943_v32 = vadd.f32 %v2534_v61, %v942_v31  ;;  %v1042_v35 = vmax.f32 %v940_v28, 0.0 }
 0x2a0   : > { %v1045_v34 = vmax.f32 %v951_v30, 0.0 }
 0x2a1   : > { %v1043_v36 = vmax.f32 %v943_v32, 0.0 }
 0x2a2   : > { %v1071_v37 = vpack.c.bf16 %v1045_v34, %v1044_v33 }
 0x2a3   : > { %v1070_v38 = vpack.c.bf16 %v1043_v36, %v1042_v35 }
 0x2a5   : > { %1263 = vmatmul.mubr.bf16.gmra.mrb[32].mxu1 %v1070_v38 }
 0x2a6   : > { %1272 = vmatprep.mubr.bf16.mxu1 %v2176_v60 }
 0x2ab   : > { %v1817_v39 = vpop.f32.mrb[76].mxu0 }
 0x2ac   : > { %v964_v40 = vadd.f32 %v1817_v39, %v2534_v61  ;;  %v955_v41 = vpop.f32.mrb[77].mxu0 }
 0x2ad   : > { %v956_v42 = vadd.f32 %v2534_v61, %v955_v41  ;;  %v1818_v43 = vpop.f32.mrb[78].mxu0  ;;  %1273 = vmatmul.mubr.bf16.gmra.mrb[36].mxu1 %v1071_v37 }
 0x2ae   : > { %v967_v44 = vadd.f32 %v1818_v43, %v2534_v61  ;;  %v958_v45 = vpop.f32.mrb[79].mxu0  ;;  %1282 = vmatprep.mubr.bf16.mxu1 %v2176_v60  ;;  %v1048_v47 = vmax.f32 %v964_v40, 0.0 }
 0x2af   : > { %v959_v46 = vadd.f32 %v2534_v61, %v958_v45  ;;  %v1046_v49 = vmax.f32 %v956_v42, 0.0 }
 0x2b0   : > { %v1049_v48 = vmax.f32 %v967_v44, 0.0 }
 0x2b1   : > { %v1047_v50 = vmax.f32 %v959_v46, 0.0 }
 0x2b2   : > { %v1073_v51 = vpack.c.bf16 %v1049_v48, %v1048_v47  ;;  %v1100_v47 = vlaneseq }
 0x2b3   : > { %v1072_v52 = vpack.c.bf16 %v1047_v50, %v1046_v49  ;;  %v1098_v50 = vld [vmem:[%s2791_s6] sm:$0x3] }
 0x2b4   : > { %v1101_v48 = vshrl.u32 %v1100_v47, 7 }
 0x2b5   : > { %1283 = vmatmul.mubr.bf16.gmra.mrb[40].mxu1 %v1072_v52 }
 0x2b6   : > { %1292 = vmatprep.mubr.bf16.mxu1 %v2176_v60  ;;  %v1102_v49 = vsub.s32 0, %v1101_v48 }
 0x2bb   : > { %v1821_v53 = vpop.f32.mrb[0].mxu1 }
 0x2bc   : > { %v980_v54 = vadd.f32 %v1821_v53, %v2534_v61  ;;  %v971_v55 = vpop.f32.mrb[1].mxu1 }
 0x2bd   : > { %v972_v56 = vadd.f32 %v2534_v61, %v971_v55  ;;  %v1822_v58 = vpop.f32.mrb[2].mxu1  ;;  %1293 = vmatmul.mubr.bf16.gmra.mrb[44].mxu1 %v1073_v51  ;;  %v1106_v51 = vsub.s32 1, %v1101_v48 }
 0x2be   : > { %v983_v59 = vadd.f32 %v1822_v58, %v2534_v61  ;;  %v974_v62 = vpop.f32.mrb[3].mxu1  ;;  %1302 = vmatprep.mubr.bf16.mxu1 %v2176_v60  ;;  %v1052_v0 = vmax.f32 %v980_v54, 0.0 }
 0x2bf   : > { %v975_v63 = vadd.f32 %v2534_v61, %v974_v62  ;;  %v1050_v2 = vmax.f32 %v972_v56, 0.0  ;;  %v2588_v52 = vrot.slane %v1098_v50, %v1106_v51 }
 0x2c0   : > { %v1053_v1 = vmax.f32 %v983_v59, 0.0 }
 0x2c1   : > { %v1051_v57 = vmax.f32 %v975_v63, 0.0 }
 0x2c2   : > { %v1075_v3 = vpack.c.bf16 %v1053_v1, %v1052_v0 }
 0x2c3   : > { %v1074_v4 = vpack.c.bf16 %v1051_v57, %v1050_v2 }
 0x2c5   : > { %1303 = vmatmul.mubr.bf16.gmra.mrb[48].mxu1 %v1074_v4 }
 0x2c6   : > { %1312 = vmatprep.mubr.bf16.mxu1 %v2176_v60 }
 0x2cb   : > { %v1825_v5 = vpop.f32.mrb[4].mxu1 }
 0x2cc   : > { %v996_v6 = vadd.f32 %v1825_v5, %v2534_v61  ;;  %v987_v7 = vpop.f32.mrb[5].mxu1 }
 0x2cd   : > { %v988_v8 = vadd.f32 %v2534_v61, %v987_v7  ;;  %v1826_v9 = vpop.f32.mrb[6].mxu1  ;;  %1313 = vmatmul.mubr.bf16.gmra.mrb[52].mxu1 %v1075_v3 }
 0x2ce   : > { %v999_v10 = vadd.f32 %v1826_v9, %v2534_v61  ;;  %v990_v11 = vpop.f32.mrb[7].mxu1  ;;  %1322 = vmatprep.mubr.bf16.mxu1 %v2176_v60  ;;  %v1056_v13 = vmax.f32 %v996_v6, 0.0 }
 0x2cf   : > { %v991_v12 = vadd.f32 %v2534_v61, %v990_v11  ;;  %v1054_v15 = vmax.f32 %v988_v8, 0.0 }
 0x2d0   : > { %v1057_v14 = vmax.f32 %v999_v10, 0.0 }
 0x2d1   : > { %v1055_v16 = vmax.f32 %v991_v12, 0.0 }
 0x2d2   : > { %v1077_v17 = vpack.c.bf16 %v1057_v14, %v1056_v13 }
 0x2d3   : > { %v1076_v18 = vpack.c.bf16 %v1055_v16, %v1054_v15 }
 0x2d5   : > { %1323 = vmatmul.mubr.bf16.gmra.mrb[56].mxu1 %v1076_v18 }
 0x2d6   : > { %1332 = vmatprep.mubr.bf16.mxu1 %v2176_v60 }
 0x2db   : > { %v1829_v19 = vpop.f32.mrb[8].mxu1 }
 0x2dc   : > { %v1012_v20 = vadd.f32 %v1829_v19, %v2534_v61  ;;  %v1003_v21 = vpop.f32.mrb[9].mxu1 }
 0x2dd   : > { %v1004_v22 = vadd.f32 %v2534_v61, %v1003_v21  ;;  %v1830_v23 = vpop.f32.mrb[10].mxu1  ;;  %1333 = vmatmul.mubr.bf16.gmra.mrb[60].mxu1 %v1077_v17 }
 0x2de   : > { %v1015_v24 = vadd.f32 %v1830_v23, %v2534_v61  ;;  %v1006_v25 = vpop.f32.mrb[11].mxu1  ;;  %1342 = vmatprep.mubr.bf16.mxu1 %v2176_v60  ;;  %v1060_v27 = vmax.f32 %v1012_v20, 0.0 }
 0x2df   : > { %v1007_v26 = vadd.f32 %v2534_v61, %v1006_v25  ;;  %v1058_v29 = vmax.f32 %v1004_v22, 0.0 }
 0x2e0   : > { %v1061_v28 = vmax.f32 %v1015_v24, 0.0 }
 0x2e1   : > { %v1059_v30 = vmax.f32 %v1007_v26, 0.0 }
 0x2e2   : > { %v1079_v31 = vpack.c.bf16 %v1061_v28, %v1060_v27 }
 0x2e3   : > { %v1078_v32 = vpack.c.bf16 %v1059_v30, %v1058_v29 }
 0x2e5   : > { %1343 = vmatmul.mubr.bf16.gmra.mrb[64].mxu1 %v1078_v32 }
 0x2e6   : > { %1352 = vmatprep.mubr.bf16.mxu1 %v2176_v60 }
 0x2eb   : > { %v1833_v33 = vpop.f32.mrb[12].mxu1 }
 0x2ec   : > { %v1028_v34 = vadd.f32 %v1833_v33, %v2534_v61  ;;  %v1019_v35 = vpop.f32.mrb[13].mxu1 }
 0x2ed   : > { %v1020_v36 = vadd.f32 %v2534_v61, %v1019_v35  ;;  %v1834_v37 = vpop.f32.mrb[14].mxu1  ;;  %1353 = vmatmul.mubr.bf16.gmra.mrb[68].mxu1 %v1079_v31 }
 0x2ee   : > { %v1031_v38 = vadd.f32 %v1834_v37, %v2534_v61  ;;  %v1022_v39 = vpop.f32.mrb[15].mxu1  ;;  %1362 = vmatprep.mubr.bf16.mxu1 %v2176_v60  ;;  %v1064_v41 = vmax.f32 %v1028_v34, 0.0 }
 0x2ef   : > { %v1023_v40 = vadd.f32 %v2534_v61, %v1022_v39  ;;  %v1062_v43 = vmax.f32 %v1020_v36, 0.0  ;;  %v2586_v61 = vrot.slane %v1098_v50, %v1102_v49 }
 0x2f0   : > { %v1065_v42 = vmax.f32 %v1031_v38, 0.0 }
 0x2f1   : > { %v1063_v44 = vmax.f32 %v1023_v40, 0.0 }
 0x2f2   : > { %v1081_v45 = vpack.c.bf16 %v1065_v42, %v1064_v41 }
 0x2f3   : > { %v1080_v46 = vpack.c.bf16 %v1063_v44, %v1062_v43 }
 0x2f5   : > { %1363 = vmatmul.mubr.bf16.gmra.mrb[72].mxu1 %v1080_v46 }
 0x2f6   : > { %1372 = vmatprep.mubr.bf16.mxu1 %v2176_v60 }
 0x2fd   : > { %1373 = vmatmul.mubr.bf16.gmra.mrb[76].mxu1 %v1081_v45 }
 0x358   : > { %v1224_v53 = vpop.f32.mrb[16].mxu1 }
 0x359   : > { %v1225_v54 = vadd.f32 %v1224_v53, %v2586_v61  ;;  %v1226_v55 = vpop.f32.mrb[17].mxu1 }
 0x35a   : > { %v1227_v56 = vadd.f32 %v1226_v55, %v2588_v52  ;;  %v1228_v60 = vpop.f32.mrb[18].mxu1 }
 0x35b   : > { %1383 = vst [vmem:[%s2594_s1] sm:$0xff] %v1225_v54  ;;  %v1229_v58 = vadd.f32 %v1228_v60, %v2586_v61  ;;  %v1230_v59 = vpop.f32.mrb[19].mxu1 }
 0x35c   : > { %1384 = vst [vmem:[%s2594_s1 + $0x8] sm:$0xff] %v1227_v56  ;;  %v1231_v62 = vadd.f32 %v1230_v59, %v2588_v52 }
 0x35d   : > { %1385 = vst [vmem:[%s2594_s1 + $0x10] sm:$0xff] %v1229_v58 }
 0x35e   : > { %1386 = vst [vmem:[%s2594_s1 + $0x18] sm:$0xff] %v1231_v62 }
 0x360   : > { %v1234_v63 = vpop.f32.mrb[20].mxu1 }
 0x361   : > { %v1235_v0 = vadd.f32 %v1234_v63, %v2586_v61  ;;  %v1236_v1 = vpop.f32.mrb[21].mxu1 }
 0x362   : > { %v1237_v2 = vadd.f32 %v1236_v1, %v2588_v52  ;;  %v1238_v57 = vpop.f32.mrb[22].mxu1 }
 0x363   : > { %1387 = vst [vmem:[%s2594_s1 + $0x20] sm:$0xff] %v1235_v0  ;;  %v1239_v3 = vadd.f32 %v1238_v57, %v2586_v61  ;;  %v1240_v4 = vpop.f32.mrb[23].mxu1 }
 0x364   : > { %1388 = vst [vmem:[%s2594_s1 + $0x28] sm:$0xff] %v1237_v2  ;;  %v1241_v5 = vadd.f32 %v1240_v4, %v2588_v52 }
 0x365   : > { %1389 = vst [vmem:[%s2594_s1 + $0x30] sm:$0xff] %v1239_v3 }
 0x366   : > { %1390 = vst [vmem:[%s2594_s1 + $0x38] sm:$0xff] %v1241_v5 }
 0x368   : > { %v1244_v6 = vpop.f32.mrb[24].mxu1 }
 0x369   : > { %v1245_v7 = vadd.f32 %v1244_v6, %v2586_v61  ;;  %v1246_v8 = vpop.f32.mrb[25].mxu1 }
 0x36a   : > { %v1247_v9 = vadd.f32 %v1246_v8, %v2588_v52  ;;  %v1248_v10 = vpop.f32.mrb[26].mxu1 }
 0x36b   : > { %1391 = vst [vmem:[%s2594_s1 + $0x40] sm:$0xff] %v1245_v7  ;;  %v1249_v11 = vadd.f32 %v1248_v10, %v2586_v61  ;;  %v1250_v12 = vpop.f32.mrb[27].mxu1 }
 0x36c   : > { %1392 = vst [vmem:[%s2594_s1 + $0x48] sm:$0xff] %v1247_v9  ;;  %v1251_v13 = vadd.f32 %v1250_v12, %v2588_v52 }
 0x36d   : > { %1393 = vst [vmem:[%s2594_s1 + $0x50] sm:$0xff] %v1249_v11 }
 0x36e   : > { %1394 = vst [vmem:[%s2594_s1 + $0x58] sm:$0xff] %v1251_v13 }
 0x370   : > { %v1254_v14 = vpop.f32.mrb[28].mxu1 }
 0x371   : > { %v1255_v15 = vadd.f32 %v1254_v14, %v2586_v61  ;;  %v1256_v16 = vpop.f32.mrb[29].mxu1 }
 0x372   : > { %v1257_v17 = vadd.f32 %v1256_v16, %v2588_v52  ;;  %v1258_v18 = vpop.f32.mrb[30].mxu1 }
 0x373   : > { %1395 = vst [vmem:[%s2594_s1 + $0x60] sm:$0xff] %v1255_v15  ;;  %v1259_v19 = vadd.f32 %v1258_v18, %v2586_v61  ;;  %v1260_v20 = vpop.f32.mrb[31].mxu1 }
 0x374   : > { %1396 = vst [vmem:[%s2594_s1 + $0x68] sm:$0xff] %v1257_v17  ;;  %v1261_v21 = vadd.f32 %v1260_v20, %v2588_v52 }
 0x375   : > { %1397 = vst [vmem:[%s2594_s1 + $0x70] sm:$0xff] %v1259_v19 }
 0x376   : > { %1398 = vst [vmem:[%s2594_s1 + $0x78] sm:$0xff] %v1261_v21 }
 0x378   : > { %v1264_v22 = vpop.f32.mrb[32].mxu1 }
 0x379   : > { %v1265_v23 = vadd.f32 %v1264_v22, %v2586_v61  ;;  %v1266_v24 = vpop.f32.mrb[33].mxu1 }
 0x37a   : > { %v1267_v25 = vadd.f32 %v1266_v24, %v2588_v52  ;;  %v1268_v26 = vpop.f32.mrb[34].mxu1 }
 0x37b   : > { %1399 = vst [vmem:[%s2594_s1 + $0x80] sm:$0xff] %v1265_v23  ;;  %v1269_v27 = vadd.f32 %v1268_v26, %v2586_v61  ;;  %v1270_v28 = vpop.f32.mrb[35].mxu1 }
 0x37c   : > { %1400 = vst [vmem:[%s2594_s1 + $0x88] sm:$0xff] %v1267_v25  ;;  %v1271_v29 = vadd.f32 %v1270_v28, %v2588_v52 }
 0x37d   : > { %1401 = vst [vmem:[%s2594_s1 + $0x90] sm:$0xff] %v1269_v27 }
 0x37e   : > { %1402 = vst [vmem:[%s2594_s1 + $0x98] sm:$0xff] %v1271_v29 }
 0x380   : > { %v1274_v30 = vpop.f32.mrb[36].mxu1 }
 0x381   : > { %v1275_v31 = vadd.f32 %v1274_v30, %v2586_v61  ;;  %v1276_v32 = vpop.f32.mrb[37].mxu1 }
 0x382   : > { %v1277_v33 = vadd.f32 %v1276_v32, %v2588_v52  ;;  %v1278_v34 = vpop.f32.mrb[38].mxu1 }
 0x383   : > { %1403 = vst [vmem:[%s2594_s1 + $0xa0] sm:$0xff] %v1275_v31  ;;  %v1279_v35 = vadd.f32 %v1278_v34, %v2586_v61  ;;  %v1280_v36 = vpop.f32.mrb[39].mxu1 }
 0x384   : > { %1404 = vst [vmem:[%s2594_s1 + $0xa8] sm:$0xff] %v1277_v33  ;;  %v1281_v37 = vadd.f32 %v1280_v36, %v2588_v52 }
 0x385   : > { %1405 = vst [vmem:[%s2594_s1 + $0xb0] sm:$0xff] %v1279_v35 }
 0x386   : > { %1406 = vst [vmem:[%s2594_s1 + $0xb8] sm:$0xff] %v1281_v37 }
 0x388   : > { %v1284_v38 = vpop.f32.mrb[40].mxu1 }
 0x389   : > { %v1285_v39 = vadd.f32 %v1284_v38, %v2586_v61  ;;  %v1286_v40 = vpop.f32.mrb[41].mxu1 }
 0x38a   : > { %v1287_v41 = vadd.f32 %v1286_v40, %v2588_v52  ;;  %v1288_v42 = vpop.f32.mrb[42].mxu1 }
 0x38b   : > { %1407 = vst [vmem:[%s2594_s1 + $0xc0] sm:$0xff] %v1285_v39  ;;  %v1289_v43 = vadd.f32 %v1288_v42, %v2586_v61  ;;  %v1290_v44 = vpop.f32.mrb[43].mxu1 }
 0x38c   : > { %1408 = vst [vmem:[%s2594_s1 + $0xc8] sm:$0xff] %v1287_v41  ;;  %v1291_v45 = vadd.f32 %v1290_v44, %v2588_v52 }
 0x38d   : > { %1409 = vst [vmem:[%s2594_s1 + $0xd0] sm:$0xff] %v1289_v43 }
 0x38e   : > { %1410 = vst [vmem:[%s2594_s1 + $0xd8] sm:$0xff] %v1291_v45 }
 0x390   : > { %v1294_v46 = vpop.f32.mrb[44].mxu1 }
 0x391   : > { %v1295_v47 = vadd.f32 %v1294_v46, %v2586_v61  ;;  %v1296_v48 = vpop.f32.mrb[45].mxu1 }
 0x392   : > { %v1297_v49 = vadd.f32 %v1296_v48, %v2588_v52  ;;  %v1298_v50 = vpop.f32.mrb[46].mxu1 }
 0x393   : > { %1411 = vst [vmem:[%s2594_s1 + $0xe0] sm:$0xff] %v1295_v47  ;;  %v1299_v51 = vadd.f32 %v1298_v50, %v2586_v61  ;;  %v1300_v53 = vpop.f32.mrb[47].mxu1 }
 0x394   : > { %1412 = vst [vmem:[%s2594_s1 + $0xe8] sm:$0xff] %v1297_v49  ;;  %v1301_v54 = vadd.f32 %v1300_v53, %v2588_v52 }
 0x395   : > { %1413 = vst [vmem:[%s2594_s1 + $0xf0] sm:$0xff] %v1299_v51 }
 0x396   : > { %1414 = vst [vmem:[%s2594_s1 + $0xf8] sm:$0xff] %v1301_v54 }
 0x398   : > { %v1304_v55 = vpop.f32.mrb[48].mxu1 }
 0x399   : > { %v1305_v56 = vadd.f32 %v1304_v55, %v2586_v61  ;;  %v1306_v60 = vpop.f32.mrb[49].mxu1 }
 0x39a   : > { %v1307_v58 = vadd.f32 %v1306_v60, %v2588_v52  ;;  %v1308_v59 = vpop.f32.mrb[50].mxu1 }
 0x39b   : > { %1415 = vst [vmem:[%s2594_s1 + $0x100] sm:$0xff] %v1305_v56  ;;  %v1309_v62 = vadd.f32 %v1308_v59, %v2586_v61  ;;  %v1310_v63 = vpop.f32.mrb[51].mxu1 }
 0x39c   : > { %1416 = vst [vmem:[%s2594_s1 + $0x108] sm:$0xff] %v1307_v58  ;;  %v1311_v0 = vadd.f32 %v1310_v63, %v2588_v52 }
 0x39d   : > { %1417 = vst [vmem:[%s2594_s1 + $0x110] sm:$0xff] %v1309_v62 }
 0x39e   : > { %1418 = vst [vmem:[%s2594_s1 + $0x118] sm:$0xff] %v1311_v0 }
 0x3a0   : > { %v1314_v1 = vpop.f32.mrb[52].mxu1 }
 0x3a1   : > { %v1315_v2 = vadd.f32 %v1314_v1, %v2586_v61  ;;  %v1316_v57 = vpop.f32.mrb[53].mxu1 }
 0x3a2   : > { %v1317_v3 = vadd.f32 %v1316_v57, %v2588_v52  ;;  %v1318_v4 = vpop.f32.mrb[54].mxu1 }
 0x3a3   : > { %1419 = vst [vmem:[%s2594_s1 + $0x120] sm:$0xff] %v1315_v2  ;;  %v1319_v5 = vadd.f32 %v1318_v4, %v2586_v61  ;;  %v1320_v6 = vpop.f32.mrb[55].mxu1 }
 0x3a4   : > { %1420 = vst [vmem:[%s2594_s1 + $0x128] sm:$0xff] %v1317_v3  ;;  %v1321_v7 = vadd.f32 %v1320_v6, %v2588_v52 }
 0x3a5   : > { %1421 = vst [vmem:[%s2594_s1 + $0x130] sm:$0xff] %v1319_v5 }
 0x3a6   : > { %1422 = vst [vmem:[%s2594_s1 + $0x138] sm:$0xff] %v1321_v7 }
 0x3a8   : > { %v1324_v8 = vpop.f32.mrb[56].mxu1 }
 0x3a9   : > { %v1325_v9 = vadd.f32 %v1324_v8, %v2586_v61  ;;  %v1326_v10 = vpop.f32.mrb[57].mxu1 }
 0x3aa   : > { %v1327_v11 = vadd.f32 %v1326_v10, %v2588_v52  ;;  %v1328_v12 = vpop.f32.mrb[58].mxu1 }
 0x3ab   : > { %1423 = vst [vmem:[%s2594_s1 + $0x140] sm:$0xff] %v1325_v9  ;;  %v1329_v13 = vadd.f32 %v1328_v12, %v2586_v61  ;;  %v1330_v14 = vpop.f32.mrb[59].mxu1 }
 0x3ac   : > { %1424 = vst [vmem:[%s2594_s1 + $0x148] sm:$0xff] %v1327_v11  ;;  %v1331_v15 = vadd.f32 %v1330_v14, %v2588_v52 }
 0x3ad   : > { %1425 = vst [vmem:[%s2594_s1 + $0x150] sm:$0xff] %v1329_v13 }
 0x3ae   : > { %1426 = vst [vmem:[%s2594_s1 + $0x158] sm:$0xff] %v1331_v15 }
 0x3b0   : > { %v1334_v16 = vpop.f32.mrb[60].mxu1 }
 0x3b1   : > { %v1335_v17 = vadd.f32 %v1334_v16, %v2586_v61  ;;  %v1336_v18 = vpop.f32.mrb[61].mxu1 }
 0x3b2   : > { %v1337_v19 = vadd.f32 %v1336_v18, %v2588_v52  ;;  %v1338_v20 = vpop.f32.mrb[62].mxu1 }
 0x3b3   : > { %1427 = vst [vmem:[%s2594_s1 + $0x160] sm:$0xff] %v1335_v17  ;;  %v1339_v21 = vadd.f32 %v1338_v20, %v2586_v61  ;;  %v1340_v22 = vpop.f32.mrb[63].mxu1 }
 0x3b4   : > { %1428 = vst [vmem:[%s2594_s1 + $0x168] sm:$0xff] %v1337_v19  ;;  %v1341_v23 = vadd.f32 %v1340_v22, %v2588_v52 }
 0x3b5   : > { %1429 = vst [vmem:[%s2594_s1 + $0x170] sm:$0xff] %v1339_v21 }
 0x3b6   : > { %1430 = vst [vmem:[%s2594_s1 + $0x178] sm:$0xff] %v1341_v23 }
 0x3b8   : > { %v1344_v24 = vpop.f32.mrb[64].mxu1 }
 0x3b9   : > { %v1345_v25 = vadd.f32 %v1344_v24, %v2586_v61  ;;  %v1346_v26 = vpop.f32.mrb[65].mxu1 }
 0x3ba   : > { %v1347_v27 = vadd.f32 %v1346_v26, %v2588_v52  ;;  %v1348_v28 = vpop.f32.mrb[66].mxu1 }
 0x3bb   : > { %1431 = vst [vmem:[%s2594_s1 + $0x180] sm:$0xff] %v1345_v25  ;;  %v1349_v29 = vadd.f32 %v1348_v28, %v2586_v61  ;;  %v1350_v30 = vpop.f32.mrb[67].mxu1 }
 0x3bc   : > { %1432 = vst [vmem:[%s2594_s1 + $0x188] sm:$0xff] %v1347_v27  ;;  %v1351_v31 = vadd.f32 %v1350_v30, %v2588_v52 }
 0x3bd   : > { %1433 = vst [vmem:[%s2594_s1 + $0x190] sm:$0xff] %v1349_v29 }
 0x3be   : > { %1434 = vst [vmem:[%s2594_s1 + $0x198] sm:$0xff] %v1351_v31 }
 0x3c0   : > { %v1354_v32 = vpop.f32.mrb[68].mxu1 }
 0x3c1   : > { %v1355_v33 = vadd.f32 %v1354_v32, %v2586_v61  ;;  %v1356_v34 = vpop.f32.mrb[69].mxu1 }
 0x3c2   : > { %v1357_v35 = vadd.f32 %v1356_v34, %v2588_v52  ;;  %v1358_v36 = vpop.f32.mrb[70].mxu1 }
 0x3c3   : > { %1435 = vst [vmem:[%s2594_s1 + $0x1a0] sm:$0xff] %v1355_v33  ;;  %v1359_v37 = vadd.f32 %v1358_v36, %v2586_v61  ;;  %v1360_v38 = vpop.f32.mrb[71].mxu1 }
 0x3c4   : > { %1436 = vst [vmem:[%s2594_s1 + $0x1a8] sm:$0xff] %v1357_v35  ;;  %v1361_v39 = vadd.f32 %v1360_v38, %v2588_v52 }
 0x3c5   : > { %1437 = vst [vmem:[%s2594_s1 + $0x1b0] sm:$0xff] %v1359_v37 }
 0x3c6   : > { %1438 = vst [vmem:[%s2594_s1 + $0x1b8] sm:$0xff] %v1361_v39 }
 0x3c8   : > { %v1364_v40 = vpop.f32.mrb[72].mxu1 }
 0x3c9   : > { %v1365_v41 = vadd.f32 %v1364_v40, %v2586_v61  ;;  %v1366_v42 = vpop.f32.mrb[73].mxu1 }
 0x3ca   : > { %v1367_v43 = vadd.f32 %v1366_v42, %v2588_v52  ;;  %v1368_v44 = vpop.f32.mrb[74].mxu1 }
 0x3cb   : > { %1439 = vst [vmem:[%s2594_s1 + $0x1c0] sm:$0xff] %v1365_v41  ;;  %v1369_v45 = vadd.f32 %v1368_v44, %v2586_v61  ;;  %v1370_v46 = vpop.f32.mrb[75].mxu1 }
 0x3cc   : > { %1440 = vst [vmem:[%s2594_s1 + $0x1c8] sm:$0xff] %v1367_v43  ;;  %v1371_v47 = vadd.f32 %v1370_v46, %v2588_v52 }
 0x3cd   : > { %1441 = vst [vmem:[%s2594_s1 + $0x1d0] sm:$0xff] %v1369_v45 }
 0x3ce   : > { %1442 = vst [vmem:[%s2594_s1 + $0x1d8] sm:$0xff] %v1371_v47 }
 0x3d0   : > { %v1374_v48 = vpop.f32.mrb[76].mxu1  ;;  %1454 = sbr.rel (!%p2820_p1) target bundleno = 1011 (0x3f3), region = 68 }
 0x3d1   : > { %v1375_v49 = vadd.f32 %v1374_v48, %v2586_v61  ;;  %v1376_v50 = vpop.f32.mrb[77].mxu1 }
 0x3d2   : > { %v1377_v51 = vadd.f32 %v1376_v50, %v2588_v52  ;;  %v1378_v53 = vpop.f32.mrb[78].mxu1 }
 0x3d3   : > { %1443 = vst [vmem:[%s2594_s1 + $0x1e0] sm:$0xff] %v1375_v49  ;;  %v1379_v54 = vadd.f32 %v1378_v53, %v2586_v61  ;;  %v1380_v55 = vpop.f32.mrb[79].mxu1 }
 0x3d4   : > { %1444 = vst [vmem:[%s2594_s1 + $0x1e8] sm:$0xff] %v1377_v51  ;;  %v1381_v56 = vadd.f32 %v1380_v55, %v2588_v52 }
 0x3d5   : > { %1445 = vst [vmem:[%s2594_s1 + $0x1f0] sm:$0xff] %v1379_v54 }
 0x3d6   : > { %1446 = vst [vmem:[%s2594_s1 + $0x1f8] sm:$0xff] %v1381_v56 }
 0x3d7   : > { %s2832_s10 = smov (!%p1457_p3, %s1456_s10), 32 }
 0x3d8   : > { %s2726_s8 = sshll.u32 %s2832_s10, 8 }
 0x3d9   : > { %s1462_s14 = ssub.s32 8192, %s2726_s8 }
 0x3da   : > { %1463 = vsyncadd %s1448_s9, %s1462_s14  ;;  %p1638_p6 = scmp.ne.s32.totalorder %s2726_s8, 0  ;;  %s1650_s13 = sshll.u32 %s2241_s28, 13 }
 0x3db   : > { %s2736_s19 = scalar_lea.hbm %s2792_s7, %s1650_s13  ;;  %s1469_s22 = sshll.u32 %s2594_s1, 4  ;;  %s2739_s22 = int_to_ptr.vmem [resolvable:$true] %s1469_s22 }
 0x3dc   : > { %s2090_s29 = scalar_lea.vmem %s2739_s22, %s2726_s8  ;;  %s2177_s24 = smov [#allocation10]  }
 0x3dd   : > { %p2091_p5 = scmp.ne.s32.totalorder %s2739_s22, %s2090_s29  ;;  %s2094_s12 = sshll.u32 %s2177_s24, 4  ;;  %s2095_s12 = int_to_ptr.vmem [resolvable:$false] %s2094_s12 }
 0x3de   : > { %s2096_s28 = scalar_lea.vmem %s2095_s12, 16384  ;;  %p2097_p0 = scmp.lt.s32.totalorder %s2739_s22, %s2095_s12 }
 0x3df   : > { %p2092_p11 = pnand %p2091_p5, %p1638_p6  ;;  %p2098_p12 = scmp.lt.s32.totalorder %s2096_s28, %s2090_s29 }
 0x3e1   : > { %p2093_p13 = pneg %p2092_p11  ;;  %p2099_p7 = por %p2098_p12, %p2097_p0 }
 0x3e3   : > { %p2100_p2 = pnand %p2099_p7, %p2093_p13 }
 0x3e5   : > { %2103 = shalt.err (!%p2100_p2)
}
 0x3e6   : > { %s2104_s15 = scalar_lea.hbm %s2736_s19, %s2726_s8  ;;  %s2108_s17 = scalar_lea.hbm %s2792_s7, 12288 }
 0x3e7   : > { %p2105_p8 = scmp.ne.s32.totalorder %s2736_s19, %s2104_s15  ;;  %p2109_p1 = scmp.lt.u32.totalorder %s2736_s19, %s2792_s7 }
 0x3e8   : > { %p2110_p3 = scmp.lt.u32.totalorder %s2108_s17, %s2104_s15  ;;  %p2112_p11 = scmp.lt.u32.totalorder %s2104_s15, %s2736_s19 }
 0x3e9   : > { %p2106_p9 = pnand %p2105_p8, %p1638_p6 }
 0x3ea   : > { %p2111_p5 = por %p2110_p3, %p2109_p1 }
 0x3eb   : > { %p2107_p10 = pneg %p2106_p9 }
 0x3ec   : > { %p2113_p13 = por %p2112_p11, %p2111_p5 }
 0x3ee   : > { %p2114_p0 = pnand %p2113_p13, %p2107_p10 }
 0x3f0   : > { %2117 = shalt.err (!%p2114_p0)
}
 0x3f1   : > { %s2178_s30 = smov 256   ;;  %s2179_s10 = smov 16  }
 0x3f2   : > { %1475 = dma.vmem_to_hbm [thread:$0]  (%p1638_p6), %s2739_s22, %s2726_s8, %s2736_s19, %s1448_s9, %s2178_s30, %s2178_s30, %s2179_s10  }
 0x3f3 PF: > { %s2821_s14 = sld [smem:[#allocation15_spill]]  ;;  %s2822_s13 = sld [smem:[#allocation18_spill]] }
 0x3f9   : > { %s1484_s16 = sand.u32 1, %s2821_s14   ;;  %p2823_p12 = scmp.ne.s32.totalorder %s2822_s13, 0 }
 0x3fa   : > { %s1485_s11 = scalar_lea.sflag [#allocation4], %s1484_s16 }
 0x3fb   : > { %p1876_p7 = pnand %p1576_p4, %p2823_p12 }
 0x3fd   : > { %2147 = dma.done.wait (!%p1876_p7), %s1485_s11, 8192  }
 0x3fe   : > { %2149 = vsyncadd (!%p1876_p7), %s1485_s11, 4294959104  ;;  %s2824_s27 = sld [smem:[#allocation16_spill]]  ;;  %s2825_s29 = sld [smem:[#allocation17_spill]] }
 0x3ff   : > { %s2826_s24 = smov %s2156_s25  ;;  %s2827_s25 = smov %s2160_s26 }
 0x404   : > { %p22_p2 = scmp.ge.s32.totalorder %s2824_s27, 4   ;;  %s2828_s26 = smov %s2825_s29 }
 0x406   :  { %24 = sbr.rel (!%p22_p2) target bundleno = 9 (0x9), region = 105 }
 0x40d   :  { %1490 = vsyncpa [#allocation3], 1 }
 0x40e   :  { %1492 = vsyncpa [#allocation3 + $0x1], 1 }
 0x40f   :  { %1493 = vsyncpa [#allocation6], 1 }
 0x410   :  { %1494 = vsyncpa [#allocation9], 1 }
 0x411   :  { %1495 = vsyncpa [#allocation4], 1 }
 0x412   :  { %1497 = vsyncpa [#allocation4 + $0x1], 1 }

</bundles_post_ra>
